<compile_context>
chip_gen: v7x
topology: tpu7x:2x2x1
jax: 0.10.0
libtpu: 0.0.40
codegen_flags: <defaults>
</compile_context>

<pallas_src>
import jax
import jax.numpy as jnp
from jax.experimental import pallas as pl
from jax.experimental.pallas import tpu as pltpu


def _round_up(v, m):
    return ((v + m - 1) // m) * m


# ----------------------------- Pallas kernels ------------------------------


def _conv_relu_pool_kernel(p_ref, w_ref, b_ref, o_ref):
    """Fused conv (as matmul) + bias + ReLU + 2x2 max-pool for one image.

    p_ref: (4, R, Kp) bf16  im2col patches; leading axis = quadrant (hi, wi)
                            of each 2x2 pool window, R = PH*PW pooled positions.
    w_ref: (Kp, Cp)   bf16  (kh, kw, ic)-ordered conv weights, lane-padded.
    b_ref: (1, Cp)    f32
    o_ref: (R, Cp)    f32   pooled activations (lane-dense store).
    """
    w = w_ref[...]
    m = jnp.dot(p_ref[0], w, preferred_element_type=jnp.float32)
    for q in range(1, 4):
        m = jnp.maximum(m, jnp.dot(p_ref[q], w, preferred_element_type=jnp.float32))
    # max_q relu(dot_q + b) == relu(max_q(dot_q) + b)
    o_ref[...] = jnp.maximum(m + b_ref[...], 0.0)


def _mlp_kernel(x_ref, w1_ref, b1_ref, w2_ref, b2_ref, w3_ref, b3_ref, o_ref):
    """Fused fc1 -> ReLU -> fc2 -> ReLU -> fc3; intermediates stay on-chip."""
    h1 = jnp.dot(x_ref[...], w1_ref[...], preferred_element_type=jnp.float32)
    h1 = jnp.maximum(h1 + b1_ref[...], 0.0).astype(jnp.bfloat16)
    h2 = jnp.dot(h1, w2_ref[...], preferred_element_type=jnp.float32)
    h2 = jnp.maximum(h2 + b2_ref[...], 0.0).astype(jnp.bfloat16)
    o = jnp.dot(h2, w3_ref[...], preferred_element_type=jnp.float32) + b3_ref[...]
    o_ref[...] = o


# ------------------------------- wrappers ----------------------------------


def conv_relu_pool(x_nhwc, wmat, bias_row, *, kh, kw, oc):
    """Valid conv (stride 1) + ReLU + 2x2/2 max-pool, fused in one kernel.

    x_nhwc: (N, H, W, C) f32.  wmat: (Kp, Cp) bf16.  bias_row: (1, Cp) f32.
    Returns (N, PH, PW, oc) f32.
    """
    N, H, W, C = x_nhwc.shape
    OH, OW = H - kh + 1, W - kw + 1
    assert OH % 2 == 0 and OW % 2 == 0
    PH, PW = OH // 2, OW // 2
    R = PH * PW
    K = kh * kw * C
    Kp, Cp = wmat.shape
    assert Kp >= K and Cp >= oc

    # im2col directly channels-last; feature order (kh, kw, ic) matches wmat.
    slabs = [x_nhwc[:, di:di + OH, dj:dj + OW, :]
             for di in range(kh) for dj in range(kw)]
    patches = jnp.concatenate(slabs, axis=-1)                     # (N, OH, OW, K)
    # Group the four positions of each 2x2 pool window onto a leading axis so
    # the kernel pools with a plain max over dots (no in-kernel strides/reshape).
    quads = [patches[:, hi::2, wi::2, :] for hi in (0, 1) for wi in (0, 1)]
    pq = jnp.stack(quads, axis=1).reshape(N, 4, R, K)
    pq = jnp.pad(pq, ((0, 0), (0, 0), (0, 0), (0, Kp - K))).astype(jnp.bfloat16)

    out = pl.pallas_call(
        _conv_relu_pool_kernel,
        out_shape=jax.ShapeDtypeStruct((N, R, Cp), jnp.float32),
        grid=(N,),
        in_specs=[
            pl.BlockSpec((None, 4, R, Kp), lambda n: (n, 0, 0, 0)),
            pl.BlockSpec((Kp, Cp), lambda n: (0, 0)),   # weights stay resident
            pl.BlockSpec((1, Cp), lambda n: (0, 0)),    # bias stays resident
        ],
        out_specs=pl.BlockSpec((None, R, Cp), lambda n: (n, 0, 0)),
        compiler_params=pltpu.CompilerParams(dimension_semantics=("parallel",)),
    )(pq, wmat, bias_row)
    return out[:, :, :oc].reshape(N, PH, PW, oc)


def mlp(x, w1, b1, w2, b2, w3, b3, *, out_features):
    """x: (M, K) f32 -> (M, out_features) f32 through the fused 3-layer MLP."""
    M, K = x.shape
    Kp = w1.shape[0]
    Np = w3.shape[1]
    tm = 256
    Mp = _round_up(M, 8)
    if Mp <= tm:
        tm = Mp
    else:
        Mp = _round_up(M, tm)
    x = jnp.pad(x, ((0, Mp - M), (0, Kp - K))).astype(jnp.bfloat16)

    const = lambda i: (0, 0)
    out = pl.pallas_call(
        _mlp_kernel,
        out_shape=jax.ShapeDtypeStruct((Mp, Np), jnp.float32),
        grid=(Mp // tm,),
        in_specs=[
            pl.BlockSpec((tm, Kp), lambda i: (i, 0)),
            pl.BlockSpec(w1.shape, const), pl.BlockSpec(b1.shape, const),
            pl.BlockSpec(w2.shape, const), pl.BlockSpec(b2.shape, const),
            pl.BlockSpec(w3.shape, const), pl.BlockSpec(b3.shape, const),
        ],
        out_specs=pl.BlockSpec((tm, Np), lambda i: (i, 0)),
        compiler_params=pltpu.CompilerParams(dimension_semantics=("parallel",)),
    )(x, w1, b1, w2, b2, w3, b3)
    return out[:M, :out_features]


# ------------------------------- the model ---------------------------------


def init_params(key):
    """Deterministic parameter init matching the nn.Module shapes (PyTorch layout)."""
    def uniform(k, shape, fan_in):
        bound = 1.0 / jnp.sqrt(jnp.float32(fan_in))
        return jax.random.uniform(k, shape, jnp.float32, -bound, bound)

    ks = jax.random.split(key, 10)
    return {
        "conv1_w": uniform(ks[0], (6, 3, 5, 5), 3 * 5 * 5),
        "conv1_b": uniform(ks[1], (6,), 3 * 5 * 5),
        "conv2_w": uniform(ks[2], (16, 6, 5, 5), 6 * 5 * 5),
        "conv2_b": uniform(ks[3], (16,), 6 * 5 * 5),
        "fc1_w": uniform(ks[4], (120, 16 * 5 * 5), 16 * 5 * 5),
        "fc1_b": uniform(ks[5], (120,), 16 * 5 * 5),
        "fc2_w": uniform(ks[6], (84, 120), 120),
        "fc2_b": uniform(ks[7], (84,), 120),
        "fc3_w": uniform(ks[8], (10, 84), 84),
        "fc3_b": uniform(ks[9], (10,), 84),
    }


def prepare_params(params):
    """One-time repack into kernel layouts: conv w -> (kh*kw*ic, oc) padded to
    (Kp, 128) bf16; linear w -> (in, out) padded to 128-multiples bf16; biases
    -> (1, Cp) f32.  fc1 columns re-ordered from torch's (c,h,w) flatten order
    to the channels-last (h,w,c) flatten used here (semantics preserved)."""
    def pad2(a, rp, cp):
        return jnp.pad(a, ((0, rp - a.shape[0]), (0, cp - a.shape[1])))

    def conv_w(w):
        oc, ic, kh, kw = w.shape
        m = w.transpose(2, 3, 1, 0).reshape(kh * kw * ic, oc)
        return pad2(m, _round_up(m.shape[0], 128),
                    _round_up(oc, 128)).astype(jnp.bfloat16)

    def lin_w(w):  # torch (out, in) -> kernel (in_p, out_p)
        m = w.T
        return pad2(m, _round_up(m.shape[0], 128),
                    _round_up(m.shape[1], 128)).astype(jnp.bfloat16)

    def bias(b):
        cp = _round_up(b.shape[0], 128)
        return jnp.pad(b, (0, cp - b.shape[0])).reshape(1, cp).astype(jnp.float32)

    fc1 = params["fc1_w"].reshape(120, 16, 5, 5).transpose(0, 2, 3, 1).reshape(120, 400)
    return {
        "c1_w": conv_w(params["conv1_w"]), "c1_b": bias(params["conv1_b"]),
        "c2_w": conv_w(params["conv2_w"]), "c2_b": bias(params["conv2_b"]),
        "f1_w": lin_w(fc1),                "f1_b": bias(params["fc1_b"]),
        "f2_w": lin_w(params["fc2_w"]),    "f2_b": bias(params["fc2_b"]),
        "f3_w": lin_w(params["fc3_w"]),    "f3_b": bias(params["fc3_b"]),
    }


def net_forward(p, x):
    """x: (N, 3, 32, 32) f32 NCHW (PyTorch layout) -> (N, 10) f32."""
    x = jnp.transpose(x, (0, 2, 3, 1))                                  # NHWC once
    x = conv_relu_pool(x, p["c1_w"], p["c1_b"], kh=5, kw=5, oc=6)       # (N,14,14,6)
    x = conv_relu_pool(x, p["c2_w"], p["c2_b"], kh=5, kw=5, oc=16)      # (N,5,5,16)
    x = x.reshape(x.shape[0], -1)                                       # (N, 400) (h,w,c)
    return mlp(x, p["f1_w"], p["f1_b"], p["f2_w"], p["f2_b"],
               p["f3_w"], p["f3_b"], out_features=10)                   # (N, 10)


if __name__ == "__main__":
    key = jax.random.PRNGKey(0)
    pkey, xkey = jax.random.split(key)
    params = init_params(pkey)
    prepared = prepare_params(params)
    # forward path requires 32x32 spatial so that 16*5*5 features reach fc1
    x = jax.random.normal(xkey, (2, 3, 32, 32), jnp.float32)

    out = jax.jit(net_forward)(prepared, x)
    out = jax.block_until_ready(out)
    assert out.shape == (2, 10) and out.dtype == jnp.float32
    assert bool(jnp.all(jnp.isfinite(out)))
    print("KERNEL_OK")
</pallas_src>

<mosaic_0001>
module attributes {stable_mosaic.version = 11 : i64} {
  func.func @_conv_relu_pool_kernel(%arg0: i32, %arg1: memref<1x4x196x128xbf16, #tpu.memory_space<vmem>>, %arg2: memref<128x128xbf16, #tpu.memory_space<vmem>>, %arg3: memref<1x128xf32, #tpu.memory_space<vmem>>, %arg4: memref<1x196x128xf32, #tpu.memory_space<vmem>>) attributes {dimension_semantics = [#tpu.dimension_semantics<parallel>], iteration_bounds = array<i64: 2>, scalar_prefetch = 0 : i64, scratch_operands = 0 : i64, tpu.core_type = #tpu.core_type<tc>, window_params = [{transform_indices = @transform_0, window_bounds = array<i64: 1, 4, 196, 128>}, {pipeline_mode = #tpu.pipeline_mode<synchronous>, transform_indices = @transform_1, window_bounds = array<i64: 128, 128>}, {pipeline_mode = #tpu.pipeline_mode<synchronous>, transform_indices = @transform_2, window_bounds = array<i64: 1, 128>}, {transform_indices = @transform_3, window_bounds = array<i64: 1, 196, 128>}]} {
    %c0 = arith.constant 0 : index
    %c0_0 = arith.constant 0 : index
    %0 = vector.load %arg2[%c0, %c0_0] : memref<128x128xbf16, #tpu.memory_space<vmem>>, vector<128x128xbf16>
    %c0_1 = arith.constant 0 : index
    %c0_2 = arith.constant 0 : index
    %c0_3 = arith.constant 0 : index
    %c0_4 = arith.constant 0 : index
    %1 = vector.load %arg1[%c0_1, %c0_2, %c0_3, %c0_4] : memref<1x4x196x128xbf16, #tpu.memory_space<vmem>>, vector<1x1x196x128xbf16>
    %2 = vector.shape_cast %1 : vector<1x1x196x128xbf16> to vector<196x128xbf16>
    %cst = arith.constant dense<0.000000e+00> : vector<196x128xf32>
    %3 = tpu.matmul %2, %0, %cst {dimension_numbers = #tpu.dot_dimension_numbers<[1], [0], [0], [1], [0, 0, 1, 1], [], []>} : vector<196x128xbf16>, vector<128x128xbf16>, vector<196x128xf32> -> vector<196x128xf32>
    %c0_5 = arith.constant 0 : index
    %c1 = arith.constant 1 : index
    %c0_6 = arith.constant 0 : index
    %c0_7 = arith.constant 0 : index
    %4 = vector.load %arg1[%c0_5, %c1, %c0_6, %c0_7] : memref<1x4x196x128xbf16, #tpu.memory_space<vmem>>, vector<1x1x196x128xbf16>
    %5 = vector.shape_cast %4 : vector<1x1x196x128xbf16> to vector<196x128xbf16>
    %cst_8 = arith.constant dense<0.000000e+00> : vector<196x128xf32>
    %6 = tpu.matmul %5, %0, %cst_8 {dimension_numbers = #tpu.dot_dimension_numbers<[1], [0], [0], [1], [0, 0, 1, 1], [], []>} : vector<196x128xbf16>, vector<128x128xbf16>, vector<196x128xf32> -> vector<196x128xf32>
    %7 = arith.maximumf %3, %6 : vector<196x128xf32>
    %c0_9 = arith.constant 0 : index
    %c2 = arith.constant 2 : index
    %c0_10 = arith.constant 0 : index
    %c0_11 = arith.constant 0 : index
    %8 = vector.load %arg1[%c0_9, %c2, %c0_10, %c0_11] : memref<1x4x196x128xbf16, #tpu.memory_space<vmem>>, vector<1x1x196x128xbf16>
    %9 = vector.shape_cast %8 : vector<1x1x196x128xbf16> to vector<196x128xbf16>
    %cst_12 = arith.constant dense<0.000000e+00> : vector<196x128xf32>
    %10 = tpu.matmul %9, %0, %cst_12 {dimension_numbers = #tpu.dot_dimension_numbers<[1], [0], [0], [1], [0, 0, 1, 1], [], []>} : vector<196x128xbf16>, vector<128x128xbf16>, vector<196x128xf32> -> vector<196x128xf32>
    %11 = arith.maximumf %7, %10 : vector<196x128xf32>
    %c0_13 = arith.constant 0 : index
    %c3 = arith.constant 3 : index
    %c0_14 = arith.constant 0 : index
    %c0_15 = arith.constant 0 : index
    %12 = vector.load %arg1[%c0_13, %c3, %c0_14, %c0_15] : memref<1x4x196x128xbf16, #tpu.memory_space<vmem>>, vector<1x1x196x128xbf16>
    %13 = vector.shape_cast %12 : vector<1x1x196x128xbf16> to vector<196x128xbf16>
    %cst_16 = arith.constant dense<0.000000e+00> : vector<196x128xf32>
    %14 = tpu.matmul %13, %0, %cst_16 {dimension_numbers = #tpu.dot_dimension_numbers<[1], [0], [0], [1], [0, 0, 1, 1], [], []>} : vector<196x128xbf16>, vector<128x128xbf16>, vector<196x128xf32> -> vector<196x128xf32>
    %15 = arith.maximumf %11, %14 : vector<196x128xf32>
    %c0_17 = arith.constant 0 : index
    %c0_18 = arith.constant 0 : index
    %16 = vector.load %arg3[%c0_17, %c0_18] : memref<1x128xf32, #tpu.memory_space<vmem>>, vector<1x128xf32>
    %17 = vector.broadcast %16 : vector<1x128xf32> to vector<196x128xf32>
    %18 = arith.addf %15, %17 : vector<196x128xf32>
    %cst_19 = arith.constant 0.000000e+00 : f32
    %19 = vector.broadcast %cst_19 : f32 to vector<196x128xf32>
    %20 = arith.maximumf %18, %19 : vector<196x128xf32>
    %c0_20 = arith.constant 0 : index
    %c0_21 = arith.constant 0 : index
    %c0_22 = arith.constant 0 : index
    %21 = vector.load %arg4[%c0_20, %c0_21, %c0_22] : memref<1x196x128xf32, #tpu.memory_space<vmem>>, vector<1x196x128xf32>
    %22 = vector.shape_cast %21 : vector<1x196x128xf32> to vector<196x128xf32>
    %23 = vector.shape_cast %20 : vector<196x128xf32> to vector<1x196x128xf32>
    tpu.vector_store %arg4[%c0_20, %c0_21, %c0_22], %23 {strides = array<i32>} : memref<1x196x128xf32, #tpu.memory_space<vmem>>, vector<1x196x128xf32>,
    return
  }
  func.func @transform_0(%arg0: i32) -> (i32, i32, i32, i32) {
    %c0_i32 = arith.constant 0 : i32
    %c0_i32_0 = arith.constant 0 : i32
    %c0_i32_1 = arith.constant 0 : i32
    %c0_i32_2 = arith.constant 0 : i32
    return %arg0, %c0_i32, %c0_i32_0, %c0_i32_1 : i32, i32, i32, i32
  }
  func.func @transform_1(%arg0: i32) -> (i32, i32) {
    %c0_i32 = arith.constant 0 : i32
    %c0_i32_0 = arith.constant 0 : i32
    %c0_i32_1 = arith.constant 0 : i32
    return %c0_i32, %c0_i32_0 : i32, i32
  }
  func.func @transform_2(%arg0: i32) -> (i32, i32) {
    %c0_i32 = arith.constant 0 : i32
    %c0_i32_0 = arith.constant 0 : i32
    %c0_i32_1 = arith.constant 0 : i32
    return %c0_i32, %c0_i32_0 : i32, i32
  }
  func.func @transform_3(%arg0: i32) -> (i32, i32, i32) {
    %c0_i32 = arith.constant 0 : i32
    %c0_i32_0 = arith.constant 0 : i32
    %c0_i32_1 = arith.constant 0 : i32
    return %arg0, %c0_i32, %c0_i32_0 : i32, i32, i32
  }
}

module attributes {stable_mosaic.version = 11 : i64} {
  func.func @_conv_relu_pool_kernel(%arg0: i32, %arg1: memref<1x4x25x256xbf16, #tpu.memory_space<vmem>>, %arg2: memref<256x128xbf16, #tpu.memory_space<vmem>>, %arg3: memref<1x128xf32, #tpu.memory_space<vmem>>, %arg4: memref<1x25x128xf32, #tpu.memory_space<vmem>>) attributes {dimension_semantics = [#tpu.dimension_semantics<parallel>], iteration_bounds = array<i64: 2>, scalar_prefetch = 0 : i64, scratch_operands = 0 : i64, tpu.core_type = #tpu.core_type<tc>, window_params = [{transform_indices = @transform_0, window_bounds = array<i64: 1, 4, 25, 256>}, {pipeline_mode = #tpu.pipeline_mode<synchronous>, transform_indices = @transform_1, window_bounds = array<i64: 256, 128>}, {pipeline_mode = #tpu.pipeline_mode<synchronous>, transform_indices = @transform_2, window_bounds = array<i64: 1, 128>}, {transform_indices = @transform_3, window_bounds = array<i64: 1, 25, 128>}]} {
    %c0 = arith.constant 0 : index
    %c0_0 = arith.constant 0 : index
    %0 = vector.load %arg2[%c0, %c0_0] : memref<256x128xbf16, #tpu.memory_space<vmem>>, vector<256x128xbf16>
    %c0_1 = arith.constant 0 : index
    %c0_2 = arith.constant 0 : index
    %c0_3 = arith.constant 0 : index
    %c0_4 = arith.constant 0 : index
    %1 = vector.load %arg1[%c0_1, %c0_2, %c0_3, %c0_4] : memref<1x4x25x256xbf16, #tpu.memory_space<vmem>>, vector<1x1x25x256xbf16>
    %2 = vector.shape_cast %1 : vector<1x1x25x256xbf16> to vector<25x256xbf16>
    %cst = arith.constant dense<0.000000e+00> : vector<25x128xf32>
    %3 = tpu.matmul %2, %0, %cst {dimension_numbers = #tpu.dot_dimension_numbers<[1], [0], [0], [1], [0, 0, 1, 1], [], []>} : vector<25x256xbf16>, vector<256x128xbf16>, vector<25x128xf32> -> vector<25x128xf32>
    %c0_5 = arith.constant 0 : index
    %c1 = arith.constant 1 : index
    %c0_6 = arith.constant 0 : index
    %c0_7 = arith.constant 0 : index
    %4 = vector.load %arg1[%c0_5, %c1, %c0_6, %c0_7] : memref<1x4x25x256xbf16, #tpu.memory_space<vmem>>, vector<1x1x25x256xbf16>
    %5 = vector.shape_cast %4 : vector<1x1x25x256xbf16> to vector<25x256xbf16>
    %cst_8 = arith.constant dense<0.000000e+00> : vector<25x128xf32>
    %6 = tpu.matmul %5, %0, %cst_8 {dimension_numbers = #tpu.dot_dimension_numbers<[1], [0], [0], [1], [0, 0, 1, 1], [], []>} : vector<25x256xbf16>, vector<256x128xbf16>, vector<25x128xf32> -> vector<25x128xf32>
    %7 = arith.maximumf %3, %6 : vector<25x128xf32>
    %c0_9 = arith.constant 0 : index
    %c2 = arith.constant 2 : index
    %c0_10 = arith.constant 0 : index
    %c0_11 = arith.constant 0 : index
    %8 = vector.load %arg1[%c0_9, %c2, %c0_10, %c0_11] : memref<1x4x25x256xbf16, #tpu.memory_space<vmem>>, vector<1x1x25x256xbf16>
    %9 = vector.shape_cast %8 : vector<1x1x25x256xbf16> to vector<25x256xbf16>
    %cst_12 = arith.constant dense<0.000000e+00> : vector<25x128xf32>
    %10 = tpu.matmul %9, %0, %cst_12 {dimension_numbers = #tpu.dot_dimension_numbers<[1], [0], [0], [1], [0, 0, 1, 1], [], []>} : vector<25x256xbf16>, vector<256x128xbf16>, vector<25x128xf32> -> vector<25x128xf32>
    %11 = arith.maximumf %7, %10 : vector<25x128xf32>
    %c0_13 = arith.constant 0 : index
    %c3 = arith.constant 3 : index
    %c0_14 = arith.constant 0 : index
    %c0_15 = arith.constant 0 : index
    %12 = vector.load %arg1[%c0_13, %c3, %c0_14, %c0_15] : memref<1x4x25x256xbf16, #tpu.memory_space<vmem>>, vector<1x1x25x256xbf16>
    %13 = vector.shape_cast %12 : vector<1x1x25x256xbf16> to vector<25x256xbf16>
    %cst_16 = arith.constant dense<0.000000e+00> : vector<25x128xf32>
    %14 = tpu.matmul %13, %0, %cst_16 {dimension_numbers = #tpu.dot_dimension_numbers<[1], [0], [0], [1], [0, 0, 1, 1], [], []>} : vector<25x256xbf16>, vector<256x128xbf16>, vector<25x128xf32> -> vector<25x128xf32>
    %15 = arith.maximumf %11, %14 : vector<25x128xf32>
    %c0_17 = arith.constant 0 : index
    %c0_18 = arith.constant 0 : index
    %16 = vector.load %arg3[%c0_17, %c0_18] : memref<1x128xf32, #tpu.memory_space<vmem>>, vector<1x128xf32>
    %17 = vector.broadcast %16 : vector<1x128xf32> to vector<25x128xf32>
    %18 = arith.addf %15, %17 : vector<25x128xf32>
    %cst_19 = arith.constant 0.000000e+00 : f32
    %19 = vector.broadcast %cst_19 : f32 to vector<25x128xf32>
    %20 = arith.maximumf %18, %19 : vector<25x128xf32>
    %c0_20 = arith.constant 0 : index
    %c0_21 = arith.constant 0 : index
    %c0_22 = arith.constant 0 : index
    %21 = vector.load %arg4[%c0_20, %c0_21, %c0_22] : memref<1x25x128xf32, #tpu.memory_space<vmem>>, vector<1x25x128xf32>
    %22 = vector.shape_cast %21 : vector<1x25x128xf32> to vector<25x128xf32>
    %23 = vector.shape_cast %20 : vector<25x128xf32> to vector<1x25x128xf32>
    tpu.vector_store %arg4[%c0_20, %c0_21, %c0_22], %23 {strides = array<i32>} : memref<1x25x128xf32, #tpu.memory_space<vmem>>, vector<1x25x128xf32>,
    return
  }
  func.func @transform_0(%arg0: i32) -> (i32, i32, i32, i32) {
    %c0_i32 = arith.constant 0 : i32
    %c0_i32_0 = arith.constant 0 : i32
    %c0_i32_1 = arith.constant 0 : i32
    %c0_i32_2 = arith.constant 0 : i32
    return %arg0, %c0_i32, %c0_i32_0, %c0_i32_1 : i32, i32, i32, i32
  }
  func.func @transform_1(%arg0: i32) -> (i32, i32) {
    %c0_i32 = arith.constant 0 : i32
    %c0_i32_0 = arith.constant 0 : i32
    %c0_i32_1 = arith.constant 0 : i32
    return %c0_i32, %c0_i32_0 : i32, i32
  }
  func.func @transform_2(%arg0: i32) -> (i32, i32) {
    %c0_i32 = arith.constant 0 : i32
    %c0_i32_0 = arith.constant 0 : i32
    %c0_i32_1 = arith.constant 0 : i32
    return %c0_i32, %c0_i32_0 : i32, i32
  }
  func.func @transform_3(%arg0: i32) -> (i32, i32, i32) {
    %c0_i32 = arith.constant 0 : i32
    %c0_i32_0 = arith.constant 0 : i32
    %c0_i32_1 = arith.constant 0 : i32
    return %arg0, %c0_i32, %c0_i32_0 : i32, i32, i32
  }
}

module attributes {stable_mosaic.version = 11 : i64} {
  func.func @_mlp_kernel(%arg0: i32, %arg1: memref<8x512xbf16, #tpu.memory_space<vmem>>, %arg2: memref<512x128xbf16, #tpu.memory_space<vmem>>, %arg3: memref<1x128xf32, #tpu.memory_space<vmem>>, %arg4: memref<128x128xbf16, #tpu.memory_space<vmem>>, %arg5: memref<1x128xf32, #tpu.memory_space<vmem>>, %arg6: memref<128x128xbf16, #tpu.memory_space<vmem>>, %arg7: memref<1x128xf32, #tpu.memory_space<vmem>>, %arg8: memref<8x128xf32, #tpu.memory_space<vmem>>) attributes {dimension_semantics = [#tpu.dimension_semantics<parallel>], iteration_bounds = array<i64: 1>, scalar_prefetch = 0 : i64, scratch_operands = 0 : i64, tpu.core_type = #tpu.core_type<tc>, window_params = [{transform_indices = @transform_0, window_bounds = array<i64: 8, 512>}, {pipeline_mode = #tpu.pipeline_mode<synchronous>, transform_indices = @transform_1, window_bounds = array<i64: 512, 128>}, {pipeline_mode = #tpu.pipeline_mode<synchronous>, transform_indices = @transform_2, window_bounds = array<i64: 1, 128>}, {pipeline_mode = #tpu.pipeline_mode<synchronous>, transform_indices = @transform_3, window_bounds = array<i64: 128, 128>}, {pipeline_mode = #tpu.pipeline_mode<synchronous>, transform_indices = @transform_4, window_bounds = array<i64: 1, 128>}, {pipeline_mode = #tpu.pipeline_mode<synchronous>, transform_indices = @transform_5, window_bounds = array<i64: 128, 128>}, {pipeline_mode = #tpu.pipeline_mode<synchronous>, transform_indices = @transform_6, window_bounds = array<i64: 1, 128>}, {transform_indices = @transform_7, window_bounds = array<i64: 8, 128>}]} {
    %c0 = arith.constant 0 : index
    %c0_0 = arith.constant 0 : index
    %0 = vector.load %arg1[%c0, %c0_0] : memref<8x512xbf16, #tpu.memory_space<vmem>>, vector<8x512xbf16>
    %c0_1 = arith.constant 0 : index
    %c0_2 = arith.constant 0 : index
    %1 = vector.load %arg2[%c0_1, %c0_2] : memref<512x128xbf16, #tpu.memory_space<vmem>>, vector<512x128xbf16>
    %cst = arith.constant dense<0.000000e+00> : vector<8x128xf32>
    %2 = tpu.matmul %0, %1, %cst {dimension_numbers = #tpu.dot_dimension_numbers<[1], [0], [0], [1], [0, 0, 1, 1], [], []>} : vector<8x512xbf16>, vector<512x128xbf16>, vector<8x128xf32> -> vector<8x128xf32>
    %c0_3 = arith.constant 0 : index
    %c0_4 = arith.constant 0 : index
    %3 = vector.load %arg3[%c0_3, %c0_4] : memref<1x128xf32, #tpu.memory_space<vmem>>, vector<1x128xf32>
    %4 = vector.broadcast %3 : vector<1x128xf32> to vector<8x128xf32>
    %5 = arith.addf %2, %4 : vector<8x128xf32>
    %cst_5 = arith.constant 0.000000e+00 : f32
    %6 = vector.broadcast %cst_5 : f32 to vector<8x128xf32>
    %7 = arith.maximumf %5, %6 : vector<8x128xf32>
    %8 = arith.truncf %7 : vector<8x128xf32> to vector<8x128xbf16>
    %c0_6 = arith.constant 0 : index
    %c0_7 = arith.constant 0 : index
    %9 = vector.load %arg4[%c0_6, %c0_7] : memref<128x128xbf16, #tpu.memory_space<vmem>>, vector<128x128xbf16>
    %cst_8 = arith.constant dense<0.000000e+00> : vector<8x128xf32>
    %10 = tpu.matmul %8, %9, %cst_8 {dimension_numbers = #tpu.dot_dimension_numbers<[1], [0], [0], [1], [0, 0, 1, 1], [], []>} : vector<8x128xbf16>, vector<128x128xbf16>, vector<8x128xf32> -> vector<8x128xf32>
    %c0_9 = arith.constant 0 : index
    %c0_10 = arith.constant 0 : index
    %11 = vector.load %arg5[%c0_9, %c0_10] : memref<1x128xf32, #tpu.memory_space<vmem>>, vector<1x128xf32>
    %12 = vector.broadcast %11 : vector<1x128xf32> to vector<8x128xf32>
    %13 = arith.addf %10, %12 : vector<8x128xf32>
    %cst_11 = arith.constant 0.000000e+00 : f32
    %14 = vector.broadcast %cst_11 : f32 to vector<8x128xf32>
    %15 = arith.maximumf %13, %14 : vector<8x128xf32>
    %16 = arith.truncf %15 : vector<8x128xf32> to vector<8x128xbf16>
    %c0_12 = arith.constant 0 : index
    %c0_13 = arith.constant 0 : index
    %17 = vector.load %arg6[%c0_12, %c0_13] : memref<128x128xbf16, #tpu.memory_space<vmem>>, vector<128x128xbf16>
    %cst_14 = arith.constant dense<0.000000e+00> : vector<8x128xf32>
    %18 = tpu.matmul %16, %17, %cst_14 {dimension_numbers = #tpu.dot_dimension_numbers<[1], [0], [0], [1], [0, 0, 1, 1], [], []>} : vector<8x128xbf16>, vector<128x128xbf16>, vector<8x128xf32> -> vector<8x128xf32>
    %c0_15 = arith.constant 0 : index
    %c0_16 = arith.constant 0 : index
    %19 = vector.load %arg7[%c0_15, %c0_16] : memref<1x128xf32, #tpu.memory_space<vmem>>, vector<1x128xf32>
    %20 = vector.broadcast %19 : vector<1x128xf32> to vector<8x128xf32>
    %21 = arith.addf %18, %20 : vector<8x128xf32>
    %c0_17 = arith.constant 0 : index
    %c0_18 = arith.constant 0 : index
    %22 = vector.load %arg8[%c0_17, %c0_18] : memref<8x128xf32, #tpu.memory_space<vmem>>, vector<8x128xf32>
    tpu.vector_store %arg8[%c0_17, %c0_18], %21 {strides = array<i32>} : memref<8x128xf32, #tpu.memory_space<vmem>>, vector<8x128xf32>,
    return
  }
  func.func @transform_0(%arg0: i32) -> (i32, i32) {
    %c0_i32 = arith.constant 0 : i32
    %c0_i32_0 = arith.constant 0 : i32
    return %arg0, %c0_i32 : i32, i32
  }
  func.func @transform_1(%arg0: i32) -> (i32, i32) {
    %c0_i32 = arith.constant 0 : i32
    %c0_i32_0 = arith.constant 0 : i32
    %c0_i32_1 = arith.constant 0 : i32
    return %c0_i32, %c0_i32_0 : i32, i32
  }
  func.func @transform_2(%arg0: i32) -> (i32, i32) {
    %c0_i32 = arith.constant 0 : i32
    %c0_i32_0 = arith.constant 0 : i32
    %c0_i32_1 = arith.constant 0 : i32
    return %c0_i32, %c0_i32_0 : i32, i32
  }
  func.func @transform_3(%arg0: i32) -> (i32, i32) {
    %c0_i32 = arith.constant 0 : i32
    %c0_i32_0 = arith.constant 0 : i32
    %c0_i32_1 = arith.constant 0 : i32
    return %c0_i32, %c0_i32_0 : i32, i32
  }
  func.func @transform_4(%arg0: i32) -> (i32, i32) {
    %c0_i32 = arith.constant 0 : i32
    %c0_i32_0 = arith.constant 0 : i32
    %c0_i32_1 = arith.constant 0 : i32
    return %c0_i32, %c0_i32_0 : i32, i32
  }
  func.func @transform_5(%arg0: i32) -> (i32, i32) {
    %c0_i32 = arith.constant 0 : i32
    %c0_i32_0 = arith.constant 0 : i32
    %c0_i32_1 = arith.constant 0 : i32
    return %c0_i32, %c0_i32_0 : i32, i32
  }
  func.func @transform_6(%arg0: i32) -> (i32, i32) {
    %c0_i32 = arith.constant 0 : i32
    %c0_i32_0 = arith.constant 0 : i32
    %c0_i32_1 = arith.constant 0 : i32
    return %c0_i32, %c0_i32_0 : i32, i32
  }
  func.func @transform_7(%arg0: i32) -> (i32, i32) {
    %c0_i32 = arith.constant 0 : i32
    %c0_i32_0 = arith.constant 0 : i32
    return %arg0, %c0_i32 : i32, i32
  }
}

</mosaic_0001>

<bundles_post_ra>
// kernel: net_forward.3
= control target key start
LH: loop header
LB: loop body
LE: loop exit
PB: predicated region body
PF: predicated region fallthrough
CT: control target
= control target key end

     0   :  { %s2002_s12 = smov 0   ;;  %s2519_s0 = inlined_call_operand.vmem [shape: bf16[2,4,196,128], index: 0, kind: input, shape index: {}]   ;;  %s2520_s1 = inlined_call_operand.vmem [shape: bf16[128,128], index: 1, kind: input, shape index: {}]   ;;  %s2521_s2 = inlined_call_operand.vmem [shape: f32[1,128], index: 2, kind: input, shape index: {}]   ;;  %s2522_s3 = inlined_call_operand.vmem [shape: f32[2,196,128], index: 3, kind: output, shape index: {}]  }
   0x1 LB: > { %s1399_s13 = sadd.s32 4294967295, %s1978_s12   ;;  %p1403_p0 = scmp.ge.s32.totalorder %s1978_s12, 1  ;;  %s1978_s12 = sphi %s2002_s12, %s13_s12  }
   0x2   : > { %p137_p1 = scmp.lt.s32.totalorder %s1978_s12, 3 }
   0x4   : > { %p138_p2 = pnand %p1403_p0, %p137_p1 }
   0x5   : > { %v1912_v0 = vld [vmem:[%s2520_s1] sm:$0xff] (!%p138_p2)   ;;  %v1980_v1 = vmov (!%p138_p2), 0.0   ;;  %v1913_v2 = vld [vmem:[%s2520_s1 + $0x8] sm:$0xff] (!%p138_p2)   ;;  %p161_p3 = scmp.lt.s32.totalorder (!%p138_p2), %s1399_s13, 1  ;;  %vm1981_vm0 = vmmov (!%p138_p2), 0   ;;  %v1914_v3 = vld [vmem:[%s2520_s1 + $0x10] sm:$0xff] (!%p138_p2)  }
   0x6   : > { %141 = sbr.rel (%p138_p2) target bundleno = 459 (0x1cb), region = 32  ;;  %1628 = vmatprep.subr.bf16.mxu0 (!%p138_p2), %v1980_v1  ;;  %1696 = vmatprep.subr.bf16.mxu1 (!%p138_p2), %v1980_v1  ;;  %v1915_v4 = vld [vmem:[%s2520_s1 + $0x18] sm:$0xff] (!%p138_p2)   ;;  %v1916_v5 = vld [vmem:[%s2520_s1 + $0x20] sm:$0xff] (!%p138_p2)   ;;  %v1917_v6 = vld [vmem:[%s2520_s1 + $0x28] sm:$0xff] (!%p138_p2)  }
   0x7   : > { %1629 = vmatpush3.bf16.msra.mxu0 (!%p138_p2), %v1912_v0  ;;  %1697 = vmatpush3.bf16.msra.mxu1 (!%p138_p2), %v1912_v0  ;;  %v1918_v7 = vld [vmem:[%s2520_s1 + $0x30] sm:$0xff] (!%p138_p2)   ;;  %v1919_v8 = vld [vmem:[%s2520_s1 + $0x38] sm:$0xff] (!%p138_p2)  }
   0x8   : > { %1630 = vmatprep.subr.bf16.mxu0 (!%p138_p2), %v1980_v1  ;;  %1698 = vmatprep.subr.bf16.mxu1 (!%p138_p2), %v1980_v1 }
   0x9   : > { %1644 = vmatprep.mubr.msk.bf16.mxu0 (!%p138_p2), %vm1981_vm0, %v1980_v1  ;;  %1712 = vmatprep.mubr.msk.bf16.mxu1 (!%p138_p2), %vm1981_vm0, %v1980_v1 }
   0xb   : > { %1631 = vmatpush3.bf16.msra.mxu0 (!%p138_p2), %v1913_v2  ;;  %1699 = vmatpush3.bf16.msra.mxu1 (!%p138_p2), %v1913_v2 }
   0xc   : > { %1632 = vmatprep.subr.bf16.mxu0 (!%p138_p2), %v1980_v1  ;;  %1700 = vmatprep.subr.bf16.mxu1 (!%p138_p2), %v1980_v1 }
   0xd   : > { %s2548_s13 = smov (!%p161_p3, %s1399_s13), 1 }
   0xe   : > { %s1900_s20 = smul.u32 400, %s2548_s13 }
   0xf   : > { %1633 = vmatpush3.bf16.msra.mxu0 %v1914_v3  ;;  %1701 = vmatpush3.bf16.msra.mxu1 %v1914_v3  ;;  %s1901_s7 = smul.u32 200, %s2548_s13 }
  0x10   : > { %s2035_s23 = scalar_lea.vmem %s2519_s0, %s1900_s20  ;;  %1634 = vmatprep.subr.bf16.mxu0 %v1980_v1  ;;  %1702 = vmatprep.subr.bf16.mxu1 %v1980_v1 }
  0x11   : > { %v1920_v9 = vld [vmem:[%s2035_s23] sm:$0xff]   ;;  %v1922_v11 = vld [vmem:[%s2035_s23 + $0x8] sm:$0xff]   ;;  %v1924_v13 = vld [vmem:[%s2035_s23 + $0x10] sm:$0xff]   ;;  %s2396_s13 = scalar_lea.vmem %s2522_s3, %s1901_s7 }
  0x12   : > { %v1921_v10 = vld [vmem:[%s2035_s23 + $0x64] sm:$0xff]   ;;  %v1923_v12 = vld [vmem:[%s2035_s23 + $0x6c] sm:$0xff]   ;;  %v1925_v14 = vld [vmem:[%s2035_s23 + $0x74] sm:$0xff]  }
  0x13   : > { %1635 = vmatpush3.bf16.msra.mxu0 %v1915_v4  ;;  %1703 = vmatpush3.bf16.msra.mxu1 %v1915_v4  ;;  %v1926_v15 = vld [vmem:[%s2035_s23 + $0x18] sm:$0xff]   ;;  %v1928_v17 = vld [vmem:[%s2035_s23 + $0x20] sm:$0xff]   ;;  %v1930_v19 = vld [vmem:[%s2035_s23 + $0x28] sm:$0xff]  }
  0x14   : > { %1636 = vmatprep.subr.bf16.mxu0 %v1980_v1  ;;  %1704 = vmatprep.subr.bf16.mxu1 %v1980_v1  ;;  %v1927_v16 = vld [vmem:[%s2035_s23 + $0x7c] sm:$0xff]   ;;  %v1929_v18 = vld [vmem:[%s2035_s23 + $0x84] sm:$0xff]   ;;  %v1931_v20 = vld [vmem:[%s2035_s23 + $0x8c] sm:$0xff]  }
  0x15   : > { %v1932_v21 = vld [vmem:[%s2035_s23 + $0x30] sm:$0xff]   ;;  %v1934_v23 = vld [vmem:[%s2035_s23 + $0x38] sm:$0xff]   ;;  %v1936_v25 = vld [vmem:[%s2035_s23 + $0x40] sm:$0xff]  }
  0x16   : > { %v1933_v22 = vld [vmem:[%s2035_s23 + $0x94] sm:$0xff]   ;;  %v1935_v24 = vld [vmem:[%s2035_s23 + $0x9c] sm:$0xff]   ;;  %v1937_v26 = vld [vmem:[%s2035_s23 + $0xa4] sm:$0xff]  }
  0x17   : > { %1637 = vmatpush3.bf16.msra.mxu0 %v1916_v5  ;;  %1705 = vmatpush3.bf16.msra.mxu1 %v1916_v5  ;;  %v1938_v27 = vld [vmem:[%s2035_s23 + $0x48] sm:$0xff]   ;;  %v1940_v29 = vld [vmem:[%s2035_s23 + $0x50] sm:$0xff]   ;;  %v1942_v31 = vld [vmem:[%s2035_s23 + $0x58] sm:$0xff]  }
  0x18   : > { %1638 = vmatprep.subr.bf16.mxu0 %v1980_v1  ;;  %1706 = vmatprep.subr.bf16.mxu1 %v1980_v1  ;;  %v1939_v28 = vld [vmem:[%s2035_s23 + $0xac] sm:$0xff]   ;;  %v1941_v30 = vld [vmem:[%s2035_s23 + $0xb4] sm:$0xff]   ;;  %v1943_v32 = vld [vmem:[%s2035_s23 + $0xbc] sm:$0xff]  }
  0x19   : > { %v1944_v33 = vld [vmem:[%s2035_s23 + $0x60] ss:$0 sps:$4 sm:$0x33]   ;;  %v1945_v34 = vld [vmem:[%s2035_s23 + $0xc4] ss:$0 sps:$4 sm:$0x33]  }
  0x1a   : > { %v1946_v35 = vld [vmem:[%s2035_s23 + $0xc8] sm:$0xff]   ;;  %v1948_v37 = vld [vmem:[%s2035_s23 + $0xd0] sm:$0xff]   ;;  %v1950_v39 = vld [vmem:[%s2035_s23 + $0xd8] sm:$0xff]  }
  0x1b   : > { %1639 = vmatpush3.bf16.msra.mxu0 %v1917_v6  ;;  %1707 = vmatpush3.bf16.msra.mxu1 %v1917_v6  ;;  %v1947_v36 = vld [vmem:[%s2035_s23 + $0x12c] sm:$0xff]   ;;  %v1949_v38 = vld [vmem:[%s2035_s23 + $0x134] sm:$0xff]   ;;  %v1951_v40 = vld [vmem:[%s2035_s23 + $0x13c] sm:$0xff]  }
  0x1c   : > { %1640 = vmatprep.subr.bf16.mxu0 %v1980_v1  ;;  %1708 = vmatprep.subr.bf16.mxu1 %v1980_v1  ;;  %v1952_v41 = vld [vmem:[%s2035_s23 + $0xe0] sm:$0xff]   ;;  %v1954_v43 = vld [vmem:[%s2035_s23 + $0xe8] sm:$0xff]   ;;  %v1956_v45 = vld [vmem:[%s2035_s23 + $0xf0] sm:$0xff]  }
  0x1d   : > { %v1953_v42 = vld [vmem:[%s2035_s23 + $0x144] sm:$0xff]   ;;  %v1955_v44 = vld [vmem:[%s2035_s23 + $0x14c] sm:$0xff]   ;;  %v1957_v46 = vld [vmem:[%s2035_s23 + $0x154] sm:$0xff]  }
  0x1e   : > { %v1958_v47 = vld [vmem:[%s2035_s23 + $0xf8] sm:$0xff]   ;;  %v1960_v49 = vld [vmem:[%s2035_s23 + $0x100] sm:$0xff]   ;;  %v1962_v51 = vld [vmem:[%s2035_s23 + $0x108] sm:$0xff]  }
  0x1f   : > { %1641 = vmatpush3.bf16.msra.mxu0 %v1918_v7  ;;  %1709 = vmatpush3.bf16.msra.mxu1 %v1918_v7  ;;  %v1959_v48 = vld [vmem:[%s2035_s23 + $0x15c] sm:$0xff]   ;;  %v1961_v50 = vld [vmem:[%s2035_s23 + $0x164] sm:$0xff]   ;;  %v1963_v52 = vld [vmem:[%s2035_s23 + $0x16c] sm:$0xff]  }
  0x20   : > { %1642 = vmatprep.subr.bf16.mxu0 %v1980_v1  ;;  %1710 = vmatprep.subr.bf16.mxu1 %v1980_v1  ;;  %v1964_v53 = vld [vmem:[%s2035_s23 + $0x110] sm:$0xff]   ;;  %v1966_v55 = vld [vmem:[%s2035_s23 + $0x118] sm:$0xff]   ;;  %v1968_v57 = vld [vmem:[%s2035_s23 + $0x120] sm:$0xff]  }
  0x21   : > { %v1965_v54 = vld [vmem:[%s2035_s23 + $0x174] sm:$0xff]   ;;  %v1967_v56 = vld [vmem:[%s2035_s23 + $0x17c] sm:$0xff]   ;;  %v1969_v58 = vld [vmem:[%s2035_s23 + $0x184] sm:$0xff]  }
  0x22   : > { %v1970_v59 = vld [vmem:[%s2035_s23 + $0x128] ss:$0 sps:$4 sm:$0x33]   ;;  %v1971_v60 = vld [vmem:[%s2035_s23 + $0x18c] ss:$0 sps:$4 sm:$0x33]  }
  0x23   : > { %1643 = vmatpush3.bf16.msra.mxu0 %v1919_v8  ;;  %1711 = vmatpush3.bf16.msra.mxu1 %v1919_v8 }
  0x24   : > { %1764 = vmatprep.subr.bf16.mxu0 %v1980_v1  ;;  %1832 = vmatprep.subr.bf16.mxu1 %v1980_v1 }
  0x26   : > { %1645 = vmatmul.mubr.bf16.vlgmr.msra.gmra.mrb[0].mxu0 %v1920_v9  ;;  %1713 = vmatmul.mubr.bf16.vlgmr.msra.gmra.mrb[0].mxu1 %v1921_v10 }
  0x27   : > { %1765 = vmatpush3.bf16.msra.mxu0 %v1912_v0  ;;  %1833 = vmatpush3.bf16.msra.mxu1 %v1912_v0 }
  0x28   : > { %1648 = vmatprep.mubr.msk.bf16.mxu0 %vm1981_vm0, %v1980_v1  ;;  %1716 = vmatprep.mubr.msk.bf16.mxu1 %vm1981_vm0, %v1980_v1 }
  0x29   : > { %1766 = vmatprep.subr.bf16.mxu0 %v1980_v1  ;;  %1834 = vmatprep.subr.bf16.mxu1 %v1980_v1 }
  0x2b   : > { %1767 = vmatpush3.bf16.msra.mxu0 %v1913_v2  ;;  %1835 = vmatpush3.bf16.msra.mxu1 %v1913_v2 }
  0x2c   : > { %1768 = vmatprep.subr.bf16.mxu0 %v1980_v1  ;;  %1836 = vmatprep.subr.bf16.mxu1 %v1980_v1 }
  0x2e   : > { %1649 = vmatmul.mubr.bf16.gmra.mrb[4].mxu0 %v1922_v11  ;;  %1717 = vmatmul.mubr.bf16.gmra.mrb[4].mxu1 %v1923_v12 }
  0x2f   : > { %1652 = vmatprep.mubr.msk.bf16.mxu0 %vm1981_vm0, %v1980_v1  ;;  %1720 = vmatprep.mubr.msk.bf16.mxu1 %vm1981_vm0, %v1980_v1 }
  0x30   : > { %1769 = vmatpush3.bf16.msra.mxu0 %v1914_v3  ;;  %1837 = vmatpush3.bf16.msra.mxu1 %v1914_v3 }
  0x31   : > { %1770 = vmatprep.subr.bf16.mxu0 %v1980_v1  ;;  %1838 = vmatprep.subr.bf16.mxu1 %v1980_v1 }
  0x34   : > { %1771 = vmatpush3.bf16.msra.mxu0 %v1915_v4  ;;  %1839 = vmatpush3.bf16.msra.mxu1 %v1915_v4 }
  0x35   : > { %1772 = vmatprep.subr.bf16.mxu0 %v1980_v1  ;;  %1840 = vmatprep.subr.bf16.mxu1 %v1980_v1 }
  0x36   : > { %1653 = vmatmul.mubr.bf16.gmra.mrb[8].mxu0 %v1924_v13  ;;  %1721 = vmatmul.mubr.bf16.gmra.mrb[8].mxu1 %v1925_v14 }
  0x37   : > { %1656 = vmatprep.mubr.msk.bf16.mxu0 %vm1981_vm0, %v1980_v1  ;;  %1724 = vmatprep.mubr.msk.bf16.mxu1 %vm1981_vm0, %v1980_v1 }
  0x38   : > { %1773 = vmatpush3.bf16.msra.mxu0 %v1916_v5  ;;  %1841 = vmatpush3.bf16.msra.mxu1 %v1916_v5 }
  0x39   : > { %1774 = vmatprep.subr.bf16.mxu0 %v1980_v1  ;;  %1842 = vmatprep.subr.bf16.mxu1 %v1980_v1 }
  0x3c   : > { %1775 = vmatpush3.bf16.msra.mxu0 %v1917_v6  ;;  %1843 = vmatpush3.bf16.msra.mxu1 %v1917_v6 }
  0x3d   : > { %1776 = vmatprep.subr.bf16.mxu0 %v1980_v1  ;;  %1844 = vmatprep.subr.bf16.mxu1 %v1980_v1 }
  0x3e   : > { %1657 = vmatmul.mubr.bf16.gmra.mrb[12].mxu0 %v1926_v15  ;;  %1725 = vmatmul.mubr.bf16.gmra.mrb[12].mxu1 %v1927_v16 }
  0x3f   : > { %1660 = vmatprep.mubr.msk.bf16.mxu0 %vm1981_vm0, %v1980_v1  ;;  %1728 = vmatprep.mubr.msk.bf16.mxu1 %vm1981_vm0, %v1980_v1 }
  0x40   : > { %1777 = vmatpush3.bf16.msra.mxu0 %v1918_v7  ;;  %1845 = vmatpush3.bf16.msra.mxu1 %v1918_v7 }
  0x41   : > { %1778 = vmatprep.subr.bf16.mxu0 %v1980_v1  ;;  %1846 = vmatprep.subr.bf16.mxu1 %v1980_v1 }
  0x44   : > { %1779 = vmatpush3.bf16.msra.mxu0 %v1919_v8  ;;  %1847 = vmatpush3.bf16.msra.mxu1 %v1919_v8 }
  0x46   : > { %1661 = vmatmul.mubr.bf16.gmra.mrb[16].mxu0 %v1928_v17  ;;  %1729 = vmatmul.mubr.bf16.gmra.mrb[16].mxu1 %v1929_v18 }
  0x47   : > { %1664 = vmatprep.mubr.msk.bf16.mxu0 %vm1981_vm0, %v1980_v1  ;;  %1732 = vmatprep.mubr.msk.bf16.mxu1 %vm1981_vm0, %v1980_v1 }
  0x4e   : > { %1665 = vmatmul.mubr.bf16.gmra.mrb[20].mxu0 %v1930_v19  ;;  %1733 = vmatmul.mubr.bf16.gmra.mrb[20].mxu1 %v1931_v20 }
  0x4f   : > { %1668 = vmatprep.mubr.msk.bf16.mxu0 %vm1981_vm0, %v1980_v1  ;;  %1736 = vmatprep.mubr.msk.bf16.mxu1 %vm1981_vm0, %v1980_v1 }
  0x56   : > { %1669 = vmatmul.mubr.bf16.gmra.mrb[24].mxu0 %v1932_v21  ;;  %1737 = vmatmul.mubr.bf16.gmra.mrb[24].mxu1 %v1933_v22 }
  0x57   : > { %1672 = vmatprep.mubr.msk.bf16.mxu0 %vm1981_vm0, %v1980_v1  ;;  %1740 = vmatprep.mubr.msk.bf16.mxu1 %vm1981_vm0, %v1980_v1 }
  0x5e   : > { %1673 = vmatmul.mubr.bf16.gmra.mrb[28].mxu0 %v1934_v23  ;;  %1741 = vmatmul.mubr.bf16.gmra.mrb[28].mxu1 %v1935_v24 }
  0x5f   : > { %1676 = vmatprep.mubr.msk.bf16.mxu0 %vm1981_vm0, %v1980_v1  ;;  %1744 = vmatprep.mubr.msk.bf16.mxu1 %vm1981_vm0, %v1980_v1 }
  0x66   : > { %1677 = vmatmul.mubr.bf16.gmra.mrb[32].mxu0 %v1936_v25  ;;  %1745 = vmatmul.mubr.bf16.gmra.mrb[32].mxu1 %v1937_v26 }
  0x67   : > { %1680 = vmatprep.mubr.msk.bf16.mxu0 %vm1981_vm0, %v1980_v1  ;;  %1748 = vmatprep.mubr.msk.bf16.mxu1 %vm1981_vm0, %v1980_v1 }
  0x6e   : > { %1681 = vmatmul.mubr.bf16.gmra.mrb[36].mxu0 %v1938_v27  ;;  %1749 = vmatmul.mubr.bf16.gmra.mrb[36].mxu1 %v1939_v28 }
  0x6f   : > { %1684 = vmatprep.mubr.msk.bf16.mxu0 %vm1981_vm0, %v1980_v1  ;;  %1752 = vmatprep.mubr.msk.bf16.mxu1 %vm1981_vm0, %v1980_v1 }
  0x76   : > { %1685 = vmatmul.mubr.bf16.gmra.mrb[40].mxu0 %v1940_v29  ;;  %1753 = vmatmul.mubr.bf16.gmra.mrb[40].mxu1 %v1941_v30 }
  0x77   : > { %1688 = vmatprep.mubr.msk.bf16.mxu0 %vm1981_vm0, %v1980_v1  ;;  %1756 = vmatprep.mubr.msk.bf16.mxu1 %vm1981_vm0, %v1980_v1 }
  0x7e   : > { %1689 = vmatmul.mubr.bf16.gmra.mrb[44].mxu0 %v1942_v31  ;;  %1757 = vmatmul.mubr.bf16.gmra.mrb[44].mxu1 %v1943_v32 }
  0x7f   : > { %1692 = vmatprep.mubr.msk.bf16.mxu0 %vm1981_vm0, %v1980_v1  ;;  %1760 = vmatprep.mubr.msk.bf16.mxu1 %vm1981_vm0, %v1980_v1 }
  0x86   : > { %1693 = vmatmul.mubr.bf16.gmra.mrb[48].mxu0 %v1944_v33  ;;  %1761 = vmatmul.mubr.bf16.gmra.mrb[48].mxu1 %v1945_v34 }
  0x87   : > { %1780 = vmatprep.mubr.msk.bf16.mxu0 %vm1981_vm0, %v1980_v1  ;;  %1848 = vmatprep.mubr.msk.bf16.mxu1 %vm1981_vm0, %v1980_v1 }
  0x8e   : > { %1781 = vmatmul.mubr.bf16.vlgmr.msra.gmra.mrb[52].mxu0 %v1946_v35  ;;  %1849 = vmatmul.mubr.bf16.vlgmr.msra.gmra.mrb[52].mxu1 %v1947_v36 }
  0x8f   : > { %1784 = vmatprep.mubr.msk.bf16.mxu0 %vm1981_vm0, %v1980_v1  ;;  %1852 = vmatprep.mubr.msk.bf16.mxu1 %vm1981_vm0, %v1980_v1 }
  0x96   : > { %1785 = vmatmul.mubr.bf16.gmra.mrb[56].mxu0 %v1948_v37  ;;  %1853 = vmatmul.mubr.bf16.gmra.mrb[56].mxu1 %v1949_v38 }
  0x97   : > { %1788 = vmatprep.mubr.msk.bf16.mxu0 %vm1981_vm0, %v1980_v1  ;;  %1856 = vmatprep.mubr.msk.bf16.mxu1 %vm1981_vm0, %v1980_v1 }
  0x9e   : > { %1789 = vmatmul.mubr.bf16.gmra.mrb[60].mxu0 %v1950_v39  ;;  %1857 = vmatmul.mubr.bf16.gmra.mrb[60].mxu1 %v1951_v40 }
  0x9f   : > { %1792 = vmatprep.mubr.msk.bf16.mxu0 %vm1981_vm0, %v1980_v1  ;;  %1860 = vmatprep.mubr.msk.bf16.mxu1 %vm1981_vm0, %v1980_v1 }
  0xa6   : > { %1793 = vmatmul.mubr.bf16.gmra.mrb[64].mxu0 %v1952_v41  ;;  %1861 = vmatmul.mubr.bf16.gmra.mrb[64].mxu1 %v1953_v42 }
  0xa7   : > { %1796 = vmatprep.mubr.msk.bf16.mxu0 %vm1981_vm0, %v1980_v1  ;;  %1864 = vmatprep.mubr.msk.bf16.mxu1 %vm1981_vm0, %v1980_v1 }
  0xae   : > { %1797 = vmatmul.mubr.bf16.gmra.mrb[68].mxu0 %v1954_v43  ;;  %1865 = vmatmul.mubr.bf16.gmra.mrb[68].mxu1 %v1955_v44 }
  0xaf   : > { %1800 = vmatprep.mubr.msk.bf16.mxu0 %vm1981_vm0, %v1980_v1  ;;  %1868 = vmatprep.mubr.msk.bf16.mxu1 %vm1981_vm0, %v1980_v1 }
  0xb6   : > { %1801 = vmatmul.mubr.bf16.gmra.mrb[72].mxu0 %v1956_v45  ;;  %1869 = vmatmul.mubr.bf16.gmra.mrb[72].mxu1 %v1957_v46 }
  0xb7   : > { %1804 = vmatprep.mubr.msk.bf16.mxu0 %vm1981_vm0, %v1980_v1  ;;  %1872 = vmatprep.mubr.msk.bf16.mxu1 %vm1981_vm0, %v1980_v1 }
  0xbe   : > { %1805 = vmatmul.mubr.bf16.gmra.mrb[76].mxu0 %v1958_v47  ;;  %1873 = vmatmul.mubr.bf16.gmra.mrb[76].mxu1 %v1959_v48 }
  0xbf   : > { %1808 = vmatprep.mubr.msk.bf16.mxu0 %vm1981_vm0, %v1980_v1  ;;  %1876 = vmatprep.mubr.msk.bf16.mxu1 %vm1981_vm0, %v1980_v1 }
  0xc6   : > { %1809 = vmatmul.mubr.bf16.gmra.mrb[80].mxu0 %v1960_v49  ;;  %1877 = vmatmul.mubr.bf16.gmra.mrb[80].mxu1 %v1961_v50 }
  0xc7   : > { %1812 = vmatprep.mubr.msk.bf16.mxu0 %vm1981_vm0, %v1980_v1  ;;  %1880 = vmatprep.mubr.msk.bf16.mxu1 %vm1981_vm0, %v1980_v1 }
  0xce   : > { %1813 = vmatmul.mubr.bf16.gmra.mrb[84].mxu0 %v1962_v51  ;;  %1881 = vmatmul.mubr.bf16.gmra.mrb[84].mxu1 %v1963_v52 }
  0xcf   : > { %1816 = vmatprep.mubr.msk.bf16.mxu0 %vm1981_vm0, %v1980_v1  ;;  %1884 = vmatprep.mubr.msk.bf16.mxu1 %vm1981_vm0, %v1980_v1 }
  0xd6   : > { %1817 = vmatmul.mubr.bf16.gmra.mrb[88].mxu0 %v1964_v53  ;;  %1885 = vmatmul.mubr.bf16.gmra.mrb[88].mxu1 %v1965_v54 }
  0xd7   : > { %1820 = vmatprep.mubr.msk.bf16.mxu0 %vm1981_vm0, %v1980_v1  ;;  %1888 = vmatprep.mubr.msk.bf16.mxu1 %vm1981_vm0, %v1980_v1 }
  0xde   : > { %1821 = vmatmul.mubr.bf16.gmra.mrb[92].mxu0 %v1966_v55  ;;  %1889 = vmatmul.mubr.bf16.gmra.mrb[92].mxu1 %v1967_v56 }
  0xdf   : > { %1824 = vmatprep.mubr.msk.bf16.mxu0 %vm1981_vm0, %v1980_v1  ;;  %1892 = vmatprep.mubr.msk.bf16.mxu1 %vm1981_vm0, %v1980_v1 }
  0xe6   : > { %1825 = vmatmul.mubr.bf16.gmra.mrb[96].mxu0 %v1968_v57  ;;  %1893 = vmatmul.mubr.bf16.gmra.mrb[96].mxu1 %v1969_v58 }
  0xe7   : > { %1828 = vmatprep.mubr.msk.bf16.mxu0 %vm1981_vm0, %v1980_v1  ;;  %1896 = vmatprep.mubr.msk.bf16.mxu1 %vm1981_vm0, %v1980_v1  ;;  %v2387_v1 = vld [vmem:[%s2521_s2] ss:$0 sm:$0xff] }
  0xee   : > { %1829 = vmatmul.mubr.bf16.gmra.mrb[100].mxu0 %v1970_v59  ;;  %1897 = vmatmul.mubr.bf16.gmra.mrb[100].mxu1 %v1971_v60 }
  0xf9   : > { %v2230_v61 = vpop.f32.mrb[0].mxu0  ;;  %v2232_v62 = vpop.f32.mrb[0].mxu1 }
  0xfa   : > { %v711_v63 = vmax.f32 %v2230_v61, %v2232_v62  ;;  %v1646_v0 = vpop.f32.mrb[1].mxu0  ;;  %v1714_v2 = vpop.f32.mrb[1].mxu1 }
  0xfb   : > { %v2236_v3 = vpop.f32.mrb[2].mxu0  ;;  %v2238_v4 = vpop.f32.mrb[2].mxu1 }
  0xfc   : > { %v1647_v5 = vpop.f32.mrb[3].mxu0  ;;  %v1715_v6 = vpop.f32.mrb[3].mxu1 }
 0x101   : > { %v2242_v7 = vpop.f32.mrb[4].mxu0  ;;  %v2244_v8 = vpop.f32.mrb[4].mxu1 }
 0x102   : > { %v1650_v10 = vpop.f32.mrb[5].mxu0  ;;  %v1718_v11 = vpop.f32.mrb[5].mxu1 }
 0x103   : > { %v2248_v12 = vpop.f32.mrb[6].mxu0  ;;  %v2250_v13 = vpop.f32.mrb[6].mxu1 }
 0x104   : > { %v1651_v15 = vpop.f32.mrb[7].mxu0  ;;  %v1719_v16 = vpop.f32.mrb[7].mxu1 }
 0x109   : > { %v2254_v17 = vpop.f32.mrb[8].mxu0  ;;  %v2256_v18 = vpop.f32.mrb[8].mxu1 }
 0x10a   : > { %v1654_v20 = vpop.f32.mrb[9].mxu0  ;;  %v1722_v21 = vpop.f32.mrb[9].mxu1 }
 0x10b   : > { %v2260_v22 = vpop.f32.mrb[10].mxu0  ;;  %v2262_v23 = vpop.f32.mrb[10].mxu1 }
 0x10c   : > { %v1655_v25 = vpop.f32.mrb[11].mxu0  ;;  %v1723_v26 = vpop.f32.mrb[11].mxu1 }
 0x111   : > { %v2266_v27 = vpop.f32.mrb[12].mxu0  ;;  %v2268_v28 = vpop.f32.mrb[12].mxu1 }
 0x112   : > { %v1658_v30 = vpop.f32.mrb[13].mxu0  ;;  %v1726_v31 = vpop.f32.mrb[13].mxu1 }
 0x113   : > { %v2272_v32 = vpop.f32.mrb[14].mxu0  ;;  %v2274_v33 = vpop.f32.mrb[14].mxu1 }
 0x114   : > { %v1659_v35 = vpop.f32.mrb[15].mxu0  ;;  %v1727_v36 = vpop.f32.mrb[15].mxu1 }
 0x119   : > { %v2278_v37 = vpop.f32.mrb[16].mxu0  ;;  %v2280_v38 = vpop.f32.mrb[16].mxu1 }
 0x11a   : > { %v1662_v40 = vpop.f32.mrb[17].mxu0  ;;  %v1730_v41 = vpop.f32.mrb[17].mxu1 }
 0x11b   : > { %v2284_v42 = vpop.f32.mrb[18].mxu0  ;;  %v2286_v43 = vpop.f32.mrb[18].mxu1 }
 0x11c   : > { %v1663_v45 = vpop.f32.mrb[19].mxu0  ;;  %v1731_v46 = vpop.f32.mrb[19].mxu1 }
 0x121   : > { %v2290_v47 = vpop.f32.mrb[20].mxu0  ;;  %v2292_v48 = vpop.f32.mrb[20].mxu1 }
 0x122   : > { %v1666_v50 = vpop.f32.mrb[21].mxu0  ;;  %v1734_v51 = vpop.f32.mrb[21].mxu1 }
 0x123   : > { %v2296_v52 = vpop.f32.mrb[22].mxu0  ;;  %v2298_v53 = vpop.f32.mrb[22].mxu1 }
 0x124   : > { %v1667_v55 = vpop.f32.mrb[23].mxu0  ;;  %v1735_v56 = vpop.f32.mrb[23].mxu1 }
 0x129   : > { %v2302_v57 = vpop.f32.mrb[24].mxu0  ;;  %v2304_v58 = vpop.f32.mrb[24].mxu1 }
 0x12a   : > { %v1670_v60 = vpop.f32.mrb[25].mxu0  ;;  %v1738_v0 = vpop.f32.mrb[25].mxu1 }
 0x12b   : > { %v2308_v2 = vpop.f32.mrb[26].mxu0  ;;  %v2310_v5 = vpop.f32.mrb[26].mxu1 }
 0x12c   : > { %v1671_v10 = vpop.f32.mrb[27].mxu0  ;;  %v1739_v11 = vpop.f32.mrb[27].mxu1 }
 0x131   : > { %v2314_v15 = vpop.f32.mrb[28].mxu0  ;;  %v2316_v16 = vpop.f32.mrb[28].mxu1 }
 0x132   : > { %v1674_v21 = vpop.f32.mrb[29].mxu0  ;;  %v1742_v25 = vpop.f32.mrb[29].mxu1 }
 0x133   : > { %v2320_v26 = vpop.f32.mrb[30].mxu0  ;;  %v2322_v30 = vpop.f32.mrb[30].mxu1 }
 0x134   : > { %v1675_v35 = vpop.f32.mrb[31].mxu0  ;;  %v1743_v36 = vpop.f32.mrb[31].mxu1 }
 0x139   : > { %v2326_v40 = vpop.f32.mrb[32].mxu0  ;;  %v2328_v41 = vpop.f32.mrb[32].mxu1 }
 0x13a   : > { %v1678_v46 = vpop.f32.mrb[33].mxu0  ;;  %v1746_v50 = vpop.f32.mrb[33].mxu1 }
 0x13b   : > { %v2332_v51 = vpop.f32.mrb[34].mxu0  ;;  %v2334_v55 = vpop.f32.mrb[34].mxu1 }
 0x13c   : > { %v1679_v60 = vpop.f32.mrb[35].mxu0  ;;  %v1747_v0 = vpop.f32.mrb[35].mxu1 }
 0x141   : > { %v2338_v10 = vpop.f32.mrb[36].mxu0  ;;  %v2340_v11 = vpop.f32.mrb[36].mxu1 }
 0x142   : > { %v1682_v25 = vpop.f32.mrb[37].mxu0  ;;  %v1750_v35 = vpop.f32.mrb[37].mxu1 }
 0x143   : > { %v2344_v36 = vpop.f32.mrb[38].mxu0  ;;  %v2346_v46 = vpop.f32.mrb[38].mxu1 }
 0x144   : > { %v1683_v45 = vpop.f32.mrb[39].mxu0  ;;  %v1751_v56 = vpop.f32.mrb[39].mxu1 }
 0x149   : > { %v2350_v60 = vpop.f32.mrb[40].mxu0  ;;  %v2352_v0 = vpop.f32.mrb[40].mxu1 }
 0x14a   : > { %v1686_v20 = vpop.f32.mrb[41].mxu0  ;;  %v1754_v21 = vpop.f32.mrb[41].mxu1 }
 0x14b   : > { %v2356_v25 = vpop.f32.mrb[42].mxu0  ;;  %v2358_v35 = vpop.f32.mrb[42].mxu1 }
 0x14c   : > { %v1687_v59 = vpop.f32.mrb[43].mxu0  ;;  %v1755_v50 = vpop.f32.mrb[43].mxu1 }
 0x151   : > { %v2362_v45 = vpop.f32.mrb[44].mxu0  ;;  %v2364_v56 = vpop.f32.mrb[44].mxu1 }
 0x152   : > { %v1690_v49 = vpop.f32.mrb[45].mxu0  ;;  %v1758_v31 = vpop.f32.mrb[45].mxu1 }
 0x153   : > { %v2368_v20 = vpop.f32.mrb[46].mxu0  ;;  %v2370_v21 = vpop.f32.mrb[46].mxu1 }
 0x154   : > { %v1691_v39 = vpop.f32.mrb[47].mxu0  ;;  %v1759_v59 = vpop.f32.mrb[47].mxu1 }
 0x159   : > { %v2374_v50 = vpop.f32.mrb[48].mxu0  ;;  %v2376_v6 = vpop.f32.mrb[48].mxu1 }
 0x15a   : > { %v1694_v54 = vpop.f32.mrb[49].mxu0  ;;  %v1762_v49 = vpop.f32.mrb[49].mxu1 }
 0x15b   : > { %v470_v31 = vpop.f32.mrb[50].mxu0  ;;  %v708_v29 = vpop.f32.mrb[50].mxu1 }
 0x15c   : > { %v1695_v24 = vpop.f32.mrb[51].mxu0  ;;  %v1763_v19 = vpop.f32.mrb[51].mxu1 }
 0x15d   : > { %v2523_v19 = vmax.f32 %v2236_v3, %v2238_v4  ;;  %v2524_v4 = vmax.f32 %v2242_v7, %v2244_v8 }
 0x161   : > { %v872_v14 = vpop.f32.mrb[52].mxu0  ;;  %v1135_v9 = vpop.f32.mrb[52].mxu1 }
 0x162   : > { %v974_v39 = vmax.f32 %v711_v63, %v872_v14  ;;  %v1782_v59 = vpop.f32.mrb[53].mxu0  ;;  %v1850_v44 = vpop.f32.mrb[53].mxu1 }
 0x163   : > { %v875_v54 = vpop.f32.mrb[54].mxu0  ;;  %v1138_v49 = vpop.f32.mrb[54].mxu1 }
 0x164   : > { %v1237_v31 = vmax.f32 %v974_v39, %v1135_v9  ;;  %v975_v24 = vmax.f32 %v2523_v19, %v875_v54  ;;  %v1783_v29 = vpop.f32.mrb[55].mxu0  ;;  %v1851_v34 = vpop.f32.mrb[55].mxu1  ;;  %v2525_v19 = vmax.f32 %v2248_v12, %v2250_v13 }
 0x166   : > { %v1269_v61 = vadd.f32 %v2387_v1, %v1237_v31  ;;  %v1238_v62 = vmax.f32 %v975_v24, %v1138_v49 }
 0x168   : > { %v1294_v63 = vmax.f32 %v1269_v61, 0.0  ;;  %v1270_v14 = vadd.f32 %v2387_v1, %v1238_v62 }
 0x169   : > { %v880_v9 = vpop.f32.mrb[56].mxu0  ;;  %v1143_v44 = vpop.f32.mrb[56].mxu1 }
 0x16a   : > { %1319 = vst [vmem:[%s2396_s13] sm:$0xff] %v1294_v63  ;;  %v1295_v3 = vmax.f32 %v1270_v14, 0.0  ;;  %v976_v34 = vmax.f32 %v2524_v4, %v880_v9  ;;  %v1786_v39 = vpop.f32.mrb[57].mxu0  ;;  %v1854_v59 = vpop.f32.mrb[57].mxu1 }
 0x16b   : > { %v883_v54 = vpop.f32.mrb[58].mxu0  ;;  %v1146_v49 = vpop.f32.mrb[58].mxu1 }
 0x16c   : > { %1320 = vst [vmem:[%s2396_s13 + $0x8] sm:$0xff] %v1295_v3  ;;  %v1239_v31 = vmax.f32 %v976_v34, %v1143_v44  ;;  %v977_v24 = vmax.f32 %v2525_v19, %v883_v54  ;;  %v1787_v29 = vpop.f32.mrb[59].mxu0  ;;  %v1855_v61 = vpop.f32.mrb[59].mxu1  ;;  %v2526_v44 = vmax.f32 %v2254_v17, %v2256_v18  ;;  %v2527_v54 = vmax.f32 %v2260_v22, %v2262_v23 }
 0x16e   : > { %v1271_v62 = vadd.f32 %v2387_v1, %v1239_v31  ;;  %v1240_v63 = vmax.f32 %v977_v24, %v1146_v49 }
 0x170   : > { %v1296_v14 = vmax.f32 %v1271_v62, 0.0  ;;  %v1272_v7 = vadd.f32 %v2387_v1, %v1240_v63 }
 0x171   : > { %v888_v8 = vpop.f32.mrb[60].mxu0  ;;  %v1151_v9 = vpop.f32.mrb[60].mxu1 }
 0x172   : > { %1321 = vst [vmem:[%s2396_s13 + $0x10] sm:$0xff] %v1296_v14  ;;  %v1297_v4 = vmax.f32 %v1272_v7, 0.0  ;;  %v978_v3 = vmax.f32 %v2526_v44, %v888_v8  ;;  %v1790_v12 = vpop.f32.mrb[61].mxu0  ;;  %v1858_v13 = vpop.f32.mrb[61].mxu1  ;;  %v2528_v14 = vmax.f32 %v2266_v27, %v2268_v28  ;;  %v2529_v44 = vmax.f32 %v2272_v32, %v2274_v33 }
 0x173   : > { %v891_v34 = vpop.f32.mrb[62].mxu0  ;;  %v1154_v39 = vpop.f32.mrb[62].mxu1 }
 0x174   : > { %1322 = vst [vmem:[%s2396_s13 + $0x18] sm:$0xff] %v1297_v4  ;;  %v1241_v59 = vmax.f32 %v978_v3, %v1151_v9  ;;  %v979_v49 = vmax.f32 %v2527_v54, %v891_v34  ;;  %v1791_v31 = vpop.f32.mrb[63].mxu0  ;;  %v1859_v19 = vpop.f32.mrb[63].mxu1 }
 0x175   : > { %v2530_v31 = vmax.f32 %v2278_v37, %v2280_v38 }
 0x176   : > { %v1273_v24 = vadd.f32 %v2387_v1, %v1241_v59  ;;  %v1242_v29 = vmax.f32 %v979_v49, %v1154_v39 }
 0x178   : > { %v1298_v61 = vmax.f32 %v1273_v24, 0.0  ;;  %v1274_v17 = vadd.f32 %v2387_v1, %v1242_v29 }
 0x179   : > { %v896_v18 = vpop.f32.mrb[64].mxu0  ;;  %v1159_v62 = vpop.f32.mrb[64].mxu1 }
 0x17a   : > { %1323 = vst [vmem:[%s2396_s13 + $0x20] sm:$0xff] %v1298_v61  ;;  %v1299_v63 = vmax.f32 %v1274_v17, 0.0  ;;  %v980_v7 = vmax.f32 %v2528_v14, %v896_v18  ;;  %v1794_v22 = vpop.f32.mrb[65].mxu0  ;;  %v1862_v23 = vpop.f32.mrb[65].mxu1  ;;  %v2531_v17 = vmax.f32 %v2284_v42, %v2286_v43 }
 0x17b   : > { %v899_v8 = vpop.f32.mrb[66].mxu0  ;;  %v1162_v9 = vpop.f32.mrb[66].mxu1 }
 0x17c   : > { %1324 = vst [vmem:[%s2396_s13 + $0x28] sm:$0xff] %v1299_v63  ;;  %v1243_v4 = vmax.f32 %v980_v7, %v1159_v62  ;;  %v981_v3 = vmax.f32 %v2529_v44, %v899_v8  ;;  %v1795_v12 = vpop.f32.mrb[67].mxu0  ;;  %v1863_v13 = vpop.f32.mrb[67].mxu1 }
 0x17d   : > { %v2533_v13 = vmax.f32 %v2296_v52, %v2298_v53 }
 0x17e   : > { %v1275_v34 = vadd.f32 %v2387_v1, %v1243_v4  ;;  %v1244_v39 = vmax.f32 %v981_v3, %v1162_v9  ;;  %v2532_v9 = vmax.f32 %v2290_v47, %v2292_v48 }
 0x180   : > { %v1300_v59 = vmax.f32 %v1275_v34, 0.0  ;;  %v1276_v27 = vadd.f32 %v2387_v1, %v1244_v39 }
 0x181   : > { %v904_v28 = vpop.f32.mrb[68].mxu0  ;;  %v1167_v54 = vpop.f32.mrb[68].mxu1 }
 0x182   : > { %1325 = vst [vmem:[%s2396_s13 + $0x30] sm:$0xff] %v1300_v59  ;;  %v1301_v49 = vmax.f32 %v1276_v27, 0.0  ;;  %v982_v19 = vmax.f32 %v2530_v31, %v904_v28  ;;  %v1798_v32 = vpop.f32.mrb[69].mxu0  ;;  %v1866_v33 = vpop.f32.mrb[69].mxu1 }
 0x183   : > { %v907_v24 = vpop.f32.mrb[70].mxu0  ;;  %v1170_v29 = vpop.f32.mrb[70].mxu1 }
 0x184   : > { %1326 = vst [vmem:[%s2396_s13 + $0x38] sm:$0xff] %v1301_v49  ;;  %v1245_v61 = vmax.f32 %v982_v19, %v1167_v54  ;;  %v983_v18 = vmax.f32 %v2531_v17, %v907_v24  ;;  %v1799_v62 = vpop.f32.mrb[71].mxu0  ;;  %v1867_v63 = vpop.f32.mrb[71].mxu1  ;;  %v2534_v19 = vmax.f32 %v2302_v57, %v2304_v58 }
 0x186   : > { %v1277_v14 = vadd.f32 %v2387_v1, %v1245_v61  ;;  %v1246_v7 = vmax.f32 %v983_v18, %v1170_v29  ;;  %v2535_v61 = vmax.f32 %v2308_v2, %v2310_v5 }
 0x188   : > { %v1302_v22 = vmax.f32 %v1277_v14, 0.0  ;;  %v1278_v37 = vadd.f32 %v2387_v1, %v1246_v7 }
 0x189   : > { %v912_v38 = vpop.f32.mrb[72].mxu0  ;;  %v1175_v23 = vpop.f32.mrb[72].mxu1 }
 0x18a   : > { %1327 = vst [vmem:[%s2396_s13 + $0x40] sm:$0xff] %v1302_v22  ;;  %v1303_v8 = vmax.f32 %v1278_v37, 0.0  ;;  %v984_v4 = vmax.f32 %v2532_v9, %v912_v38  ;;  %v1802_v42 = vpop.f32.mrb[73].mxu0  ;;  %v1870_v43 = vpop.f32.mrb[73].mxu1  ;;  %v2536_v38 = vmax.f32 %v2314_v15, %v2316_v16 }
 0x18b   : > { %v915_v44 = vpop.f32.mrb[74].mxu0  ;;  %v1178_v3 = vpop.f32.mrb[74].mxu1  ;;  %v2537_v42 = vmax.f32 %v2320_v26, %v2322_v30 }
 0x18c   : > { %1328 = vst [vmem:[%s2396_s13 + $0x48] sm:$0xff] %v1303_v8  ;;  %v1247_v12 = vmax.f32 %v984_v4, %v1175_v23  ;;  %v985_v34 = vmax.f32 %v2533_v13, %v915_v44  ;;  %v1803_v39 = vpop.f32.mrb[75].mxu0  ;;  %v1871_v59 = vpop.f32.mrb[75].mxu1 }
 0x18e   : > { %v1279_v27 = vadd.f32 %v2387_v1, %v1247_v12  ;;  %v1248_v28 = vmax.f32 %v985_v34, %v1178_v3 }
 0x190   : > { %v1304_v54 = vmax.f32 %v1279_v27, 0.0  ;;  %v1280_v47 = vadd.f32 %v2387_v1, %v1248_v28  ;;  %v2538_v27 = vmax.f32 %v2326_v40, %v2328_v41 }
 0x191   : > { %v920_v48 = vpop.f32.mrb[76].mxu0  ;;  %v1183_v49 = vpop.f32.mrb[76].mxu1 }
 0x192   : > { %1329 = vst [vmem:[%s2396_s13 + $0x50] sm:$0xff] %v1304_v54  ;;  %v1305_v31 = vmax.f32 %v1280_v47, 0.0  ;;  %v986_v32 = vmax.f32 %v2534_v19, %v920_v48  ;;  %v1806_v52 = vpop.f32.mrb[77].mxu0  ;;  %v1874_v53 = vpop.f32.mrb[77].mxu1 }
 0x193   : > { %v923_v33 = vpop.f32.mrb[78].mxu0  ;;  %v1186_v24 = vpop.f32.mrb[78].mxu1 }
 0x194   : > { %1330 = vst [vmem:[%s2396_s13 + $0x58] sm:$0xff] %v1305_v31  ;;  %v1249_v29 = vmax.f32 %v986_v32, %v1183_v49  ;;  %v987_v17 = vmax.f32 %v2535_v61, %v923_v33  ;;  %v1807_v18 = vpop.f32.mrb[79].mxu0  ;;  %v1875_v62 = vpop.f32.mrb[79].mxu1  ;;  %v2539_v49 = vmax.f32 %v2332_v51, %v2334_v55  ;;  %v2540_v61 = vmax.f32 %v2338_v10, %v2340_v11 }
 0x196   : > { %v1281_v63 = vadd.f32 %v2387_v1, %v1249_v29  ;;  %v1250_v14 = vmax.f32 %v987_v17, %v1186_v24 }
 0x198   : > { %v1306_v7 = vmax.f32 %v1281_v63, 0.0  ;;  %v1282_v57 = vadd.f32 %v2387_v1, %v1250_v14  ;;  %v2541_v14 = vmax.f32 %v2344_v36, %v2346_v46 }
 0x199   : > { %v928_v58 = vpop.f32.mrb[80].mxu0  ;;  %v1191_v22 = vpop.f32.mrb[80].mxu1 }
 0x19a   : > { %1331 = vst [vmem:[%s2396_s13 + $0x60] sm:$0xff] %v1306_v7  ;;  %v1307_v37 = vmax.f32 %v1282_v57, 0.0  ;;  %v988_v23 = vmax.f32 %v2536_v38, %v928_v58  ;;  %v1810_v2 = vpop.f32.mrb[81].mxu0  ;;  %v1878_v5 = vpop.f32.mrb[81].mxu1 }
 0x19b   : > { %v931_v8 = vpop.f32.mrb[82].mxu0  ;;  %v1194_v9 = vpop.f32.mrb[82].mxu1  ;;  %v2542_v5 = vmax.f32 %v2350_v60, %v2352_v0 }
 0x19c   : > { %1332 = vst [vmem:[%s2396_s13 + $0x68] sm:$0xff] %v1307_v37  ;;  %v1251_v4 = vmax.f32 %v988_v23, %v1191_v22  ;;  %v989_v43 = vmax.f32 %v2537_v42, %v931_v8  ;;  %v1811_v44 = vpop.f32.mrb[83].mxu0  ;;  %v1879_v3 = vpop.f32.mrb[83].mxu1 }
 0x19e   : > { %v1283_v12 = vadd.f32 %v2387_v1, %v1251_v4  ;;  %v1252_v13 = vmax.f32 %v989_v43, %v1194_v9  ;;  %v2543_v43 = vmax.f32 %v2356_v25, %v2358_v35 }
 0x1a0   : > { %v1308_v34 = vmax.f32 %v1283_v12, 0.0  ;;  %v1284_v15 = vadd.f32 %v2387_v1, %v1252_v13 }
 0x1a1   : > { %v936_v16 = vpop.f32.mrb[84].mxu0  ;;  %v1199_v39 = vpop.f32.mrb[84].mxu1 }
 0x1a2   : > { %1333 = vst [vmem:[%s2396_s13 + $0x70] sm:$0xff] %v1308_v34  ;;  %v1309_v59 = vmax.f32 %v1284_v15, 0.0  ;;  %v990_v28 = vmax.f32 %v2538_v27, %v936_v16  ;;  %v1814_v26 = vpop.f32.mrb[85].mxu0  ;;  %v1882_v30 = vpop.f32.mrb[85].mxu1 }
 0x1a3   : > { %v939_v54 = vpop.f32.mrb[86].mxu0  ;;  %v1202_v47 = vpop.f32.mrb[86].mxu1 }
 0x1a4   : > { %1334 = vst [vmem:[%s2396_s13 + $0x78] sm:$0xff] %v1309_v59  ;;  %v1253_v48 = vmax.f32 %v990_v28, %v1199_v39  ;;  %v991_v31 = vmax.f32 %v2539_v49, %v939_v54  ;;  %v1815_v19 = vpop.f32.mrb[87].mxu0  ;;  %v1883_v32 = vpop.f32.mrb[87].mxu1  ;;  %v2544_v59 = vmax.f32 %v2362_v45, %v2364_v56  ;;  %v2545_v54 = vmax.f32 %v2368_v20, %v2370_v21 }
 0x1a6   : > { %v1285_v52 = vadd.f32 %v2387_v1, %v1253_v48  ;;  %v1254_v53 = vmax.f32 %v991_v31, %v1202_v47 }
 0x1a8   : > { %v1310_v33 = vmax.f32 %v1285_v52, 0.0  ;;  %v1286_v40 = vadd.f32 %v2387_v1, %v1254_v53 }
 0x1a9   : > { %v944_v41 = vpop.f32.mrb[88].mxu0  ;;  %v1207_v24 = vpop.f32.mrb[88].mxu1 }
 0x1aa   : > { %1335 = vst [vmem:[%s2396_s13 + $0x80] sm:$0xff] %v1310_v33  ;;  %v1311_v29 = vmax.f32 %v1286_v40, 0.0  ;;  %v992_v17 = vmax.f32 %v2540_v61, %v944_v41  ;;  %v1818_v51 = vpop.f32.mrb[89].mxu0  ;;  %v1886_v55 = vpop.f32.mrb[89].mxu1  ;;  %v2546_v33 = vmax.f32 %v2374_v50, %v2376_v6 }
 0x1ab   : > { %v947_v18 = vpop.f32.mrb[90].mxu0  ;;  %v1210_v62 = vpop.f32.mrb[90].mxu1 }
 0x1ac   : > { %1336 = vst [vmem:[%s2396_s13 + $0x88] sm:$0xff] %v1311_v29  ;;  %v1255_v63 = vmax.f32 %v992_v17, %v1207_v24  ;;  %v993_v7 = vmax.f32 %v2541_v14, %v947_v18  ;;  %v1819_v57 = vpop.f32.mrb[91].mxu0  ;;  %v1887_v58 = vpop.f32.mrb[91].mxu1 }
 0x1ae   : > { %v1287_v22 = vadd.f32 %v2387_v1, %v1255_v63  ;;  %v1256_v37 = vmax.f32 %v993_v7, %v1210_v62 }
 0x1b0   : > { %v1312_v38 = vmax.f32 %v1287_v22, 0.0  ;;  %v1288_v10 = vadd.f32 %v2387_v1, %v1256_v37 }
 0x1b1   : > { %v952_v11 = vpop.f32.mrb[92].mxu0  ;;  %v1215_v23 = vpop.f32.mrb[92].mxu1 }
 0x1b2   : > { %1337 = vst [vmem:[%s2396_s13 + $0x90] sm:$0xff] %v1312_v38  ;;  %v1313_v2 = vmax.f32 %v1288_v10, 0.0  ;;  %v994_v8 = vmax.f32 %v2542_v5, %v952_v11  ;;  %v1822_v36 = vpop.f32.mrb[93].mxu0  ;;  %v1890_v46 = vpop.f32.mrb[93].mxu1 }
 0x1b3   : > { %v955_v9 = vpop.f32.mrb[94].mxu0  ;;  %v1218_v4 = vpop.f32.mrb[94].mxu1 }
 0x1b4   : > { %1338 = vst [vmem:[%s2396_s13 + $0x98] sm:$0xff] %v1313_v2  ;;  %v1257_v42 = vmax.f32 %v994_v8, %v1215_v23  ;;  %v995_v44 = vmax.f32 %v2543_v43, %v955_v9  ;;  %v1823_v3 = vpop.f32.mrb[95].mxu0  ;;  %v1891_v12 = vpop.f32.mrb[95].mxu1 }
 0x1b6   : > { %v1289_v13 = vadd.f32 %v2387_v1, %v1257_v42  ;;  %v1258_v34 = vmax.f32 %v995_v44, %v1218_v4 }
 0x1b8   : > { %v1314_v15 = vmax.f32 %v1289_v13, 0.0  ;;  %v1290_v60 = vadd.f32 %v2387_v1, %v1258_v34 }
 0x1b9   : > { %v960_v0 = vpop.f32.mrb[96].mxu0  ;;  %v1223_v16 = vpop.f32.mrb[96].mxu1 }
 0x1ba   : > { %1339 = vst [vmem:[%s2396_s13 + $0xa0] sm:$0xff] %v1314_v15  ;;  %v1315_v39 = vmax.f32 %v1290_v60, 0.0  ;;  %v996_v27 = vmax.f32 %v2544_v59, %v960_v0  ;;  %v1826_v25 = vpop.f32.mrb[97].mxu0  ;;  %v1894_v35 = vpop.f32.mrb[97].mxu1 }
 0x1bb   : > { %v963_v28 = vpop.f32.mrb[98].mxu0  ;;  %v1226_v26 = vpop.f32.mrb[98].mxu1 }
 0x1bc   : > { %1340 = vst [vmem:[%s2396_s13 + $0xa8] sm:$0xff] %v1315_v39  ;;  %v1259_v30 = vmax.f32 %v996_v27, %v1223_v16  ;;  %v997_v47 = vmax.f32 %v2545_v54, %v963_v28  ;;  %v1827_v48 = vpop.f32.mrb[99].mxu0  ;;  %v1895_v49 = vpop.f32.mrb[99].mxu1 }
 0x1be   : > { %v1291_v31 = vadd.f32 %v2387_v1, %v1259_v30  ;;  %v1260_v19 = vmax.f32 %v997_v47, %v1226_v26 }
 0x1c0   : > { %v1316_v32 = vmax.f32 %v1291_v31, 0.0  ;;  %v1292_v45 = vadd.f32 %v2387_v1, %v1260_v19 }
 0x1c1   : > { %v968_v56 = vpop.f32.mrb[100].mxu0  ;;  %v1231_v52 = vpop.f32.mrb[100].mxu1 }
 0x1c2   : > { %1341 = vst [vmem:[%s2396_s13 + $0xb0] sm:$0xff] %v1316_v32  ;;  %v1317_v53 = vmax.f32 %v1292_v45, 0.0  ;;  %v998_v40 = vmax.f32 %v2546_v33, %v968_v56  ;;  %v1830_v20 = vpop.f32.mrb[101].mxu0  ;;  %v1898_v21 = vpop.f32.mrb[101].mxu1 }
 0x1c3   : > { %v971_v41 = vpop.f32.mrb[102].mxu0  ;;  %v1234_v24 = vpop.f32.mrb[102].mxu1 }
 0x1c4   : > { %1342 = vst [vmem:[%s2396_s13 + $0xb8] sm:$0xff] %v1317_v53  ;;  %v1261_v29 = vmax.f32 %v998_v40, %v1231_v52  ;;  %v1831_v61 = vpop.f32.mrb[103].mxu0  ;;  %v1899_v17 = vpop.f32.mrb[103].mxu1 }
 0x1c6   : > { %v1293_v51 = vadd.f32 %v2387_v1, %v1261_v29 }
 0x1c8   : > { %v1318_v55 = vmax.f32 %v1293_v51, 0.0 }
 0x1ca   : > { %1343 = vst [vmem:[%s2396_s13 + $0xc0] sm:$0xf] %v1318_v55 }
 0x1cb PF: > { %s13_s12 = sadd.s32 1, %s1978_s12  }
 0x1cc   : > { %p10_p4 = scmp.ge.s32.totalorder %s13_s12, 4  }
 0x1ce   :  { %12 = sbr.rel (!%p10_p4) target bundleno = 1 (0x1), region = 65 }

// kernel: net_forward.4
= control target key start
LH: loop header
LB: loop body
LE: loop exit
PB: predicated region body
PF: predicated region fallthrough
CT: control target
= control target key end

     0   :  { %s927_s12 = smov 0   ;;  %s1059_s0 = inlined_call_operand.vmem [shape: bf16[2,4,25,256], index: 0, kind: input, shape index: {}]   ;;  %s1060_s1 = inlined_call_operand.vmem [shape: bf16[256,128], index: 1, kind: input, shape index: {}]   ;;  %s1061_s2 = inlined_call_operand.vmem [shape: f32[1,128], index: 2, kind: input, shape index: {}]   ;;  %s1062_s3 = inlined_call_operand.vmem [shape: f32[2,25,128], index: 3, kind: output, shape index: {}]  }
   0x1 LB: > { %s681_s13 = sadd.s32 4294967295, %s905_s12   ;;  %p685_p0 = scmp.ge.s32.totalorder %s905_s12, 1  ;;  %s905_s12 = sphi %s927_s12, %s13_s12  }
   0x2   : > { %p137_p1 = scmp.lt.s32.totalorder %s905_s12, 3 }
   0x4   : > { %p138_p2 = pnand %p685_p0, %p137_p1 }
   0x5   : > { %v859_v0 = vld [vmem:[%s1060_s1 + $0x40] sm:$0xff] (!%p138_p2)   ;;  %v861_v2 = vld [vmem:[%s1060_s1 + $0x48] sm:$0xff] (!%p138_p2)   ;;  %p161_p3 = scmp.lt.s32.totalorder (!%p138_p2), %s681_s13, 1  ;;  %v956_v4 = vld [vmem:[%s1060_s1 + $0x50] sm:$0xff] (!%p138_p2)  }
   0x6   : > { %141 = sbr.rel (%p138_p2) target bundleno = 304 (0x130), region = 32  ;;  %v941_v1 = vld [vmem:[%s1060_s1] sm:$0xff] (!%p138_p2)   ;;  %739 = vmatprep.subr.bf16.mxu0 (!%p138_p2), %v859_v0  ;;  %767 = vmatprep.subr.bf16.mxu1 (!%p138_p2), %v859_v0  ;;  %v951_v3 = vld [vmem:[%s1060_s1 + $0x8] sm:$0xff] (!%p138_p2)   ;;  %v963_v5 = vld [vmem:[%s1060_s1 + $0x10] sm:$0xff] (!%p138_p2)  }
   0x7   : > { %740 = vmatpush3.bf16.msra.mxu0 (!%p138_p2), %v941_v1  ;;  %768 = vmatpush3.bf16.msra.mxu1 (!%p138_p2), %v941_v1  ;;  %v972_v6 = vld [vmem:[%s1060_s1 + $0x58] sm:$0xff] (!%p138_p2)   ;;  %v987_v8 = vld [vmem:[%s1060_s1 + $0x60] sm:$0xff] (!%p138_p2)   ;;  %v869_v10 = vld [vmem:[%s1060_s1 + $0x68] sm:$0xff] (!%p138_p2)  }
   0x8   : > { %741 = vmatprep.subr.bf16.mxu0 (!%p138_p2), %v861_v2  ;;  %769 = vmatprep.subr.bf16.mxu1 (!%p138_p2), %v861_v2  ;;  %v979_v7 = vld [vmem:[%s1060_s1 + $0x18] sm:$0xff] (!%p138_p2)   ;;  %v868_v9 = vld [vmem:[%s1060_s1 + $0x20] sm:$0xff] (!%p138_p2)   ;;  %v870_v13 = vld [vmem:[%s1060_s1 + $0x28] sm:$0xff] (!%p138_p2)  }
   0x9   : > { %v871_v14 = vld [vmem:[%s1060_s1 + $0x70] sm:$0xff] (!%p138_p2)   ;;  %v873_v16 = vld [vmem:[%s1060_s1 + $0x78] sm:$0xff] (!%p138_p2)  }
   0xa   : > { %v872_v15 = vld [vmem:[%s1060_s1 + $0x30] sm:$0xff] (!%p138_p2)   ;;  %v874_v17 = vld [vmem:[%s1060_s1 + $0x38] sm:$0xff] (!%p138_p2)  }
   0xb   : > { %742 = vmatpush3.bf16.msra.mxu0 (!%p138_p2), %v951_v3  ;;  %770 = vmatpush3.bf16.msra.mxu1 (!%p138_p2), %v951_v3 }
   0xc   : > { %743 = vmatprep.subr.bf16.mxu0 (!%p138_p2), %v956_v4  ;;  %771 = vmatprep.subr.bf16.mxu1 (!%p138_p2), %v956_v4 }
   0xd   : > { %s1064_s13 = smov (!%p161_p3, %s681_s13), 1 }
   0xe   : > { %s737_s30 = sshll.u32 %s1064_s13, 7  ;;  %s738_s27 = sshll.u32 %s1064_s13, 5 }
   0xf   : > { %744 = vmatpush3.bf16.msra.mxu0 %v963_v5  ;;  %772 = vmatpush3.bf16.msra.mxu1 %v963_v5  ;;  %s992_s8 = scalar_lea.vmem %s1059_s0, %s737_s30  ;;  %s170_s30 = scalar_lea.vmem %s1062_s3, %s738_s27 }
  0x10   : > { %745 = vmatprep.subr.bf16.mxu0 %v972_v6  ;;  %773 = vmatprep.subr.bf16.mxu1 %v972_v6  ;;  %v877_v11 = vld [vmem:[%s992_s8 + $0x4] ss:$8 sps:$4 sm:$0xff]   ;;  %v875_v18 = vld [vmem:[%s992_s8] ss:$8 sps:$4 sm:$0xff]  }
  0x11   : > { %v880_v12 = vld [vmem:[%s992_s8 + $0x24] ss:$8 sps:$4 sm:$0xff]   ;;  %356 = vmatprep.mubr.bf16.mxu0 %v877_v11  ;;  %v878_v19 = vld [vmem:[%s992_s8 + $0x20] ss:$8 sps:$4 sm:$0xff]  }
  0x12   : > { %430 = vmatprep.mubr.bf16.mxu1 %v880_v12  ;;  %v881_v20 = vld [vmem:[%s992_s8 + $0x14] ss:$8 sps:$4 sm:$0x1f]   ;;  %v885_v22 = vld [vmem:[%s992_s8 + $0x10] ss:$8 sps:$4 sm:$0x1f]  }
  0x13   : > { %746 = vmatpush3.bf16.msra.mxu0 %v979_v7  ;;  %774 = vmatpush3.bf16.msra.mxu1 %v979_v7  ;;  %v883_v21 = vld [vmem:[%s992_s8 + $0x34] ss:$8 sps:$4 sm:$0x1f]   ;;  %v886_v23 = vld [vmem:[%s992_s8 + $0x30] ss:$8 sps:$4 sm:$0x1f]  }
  0x14   : > { %747 = vmatprep.subr.bf16.mxu0 %v987_v8  ;;  %775 = vmatprep.subr.bf16.mxu1 %v987_v8  ;;  %v889_v24 = vld [vmem:[%s992_s8 + $0x44] ss:$8 sps:$4 sm:$0xff]   ;;  %v887_v26 = vld [vmem:[%s992_s8 + $0x40] ss:$8 sps:$4 sm:$0xff]  }
  0x15   : > { %v892_v25 = vld [vmem:[%s992_s8 + $0x64] ss:$8 sps:$4 sm:$0xff]   ;;  %v890_v27 = vld [vmem:[%s992_s8 + $0x60] ss:$8 sps:$4 sm:$0xff]  }
  0x16   : > { %v893_v28 = vld [vmem:[%s992_s8 + $0x54] ss:$8 sps:$4 sm:$0x1f]   ;;  %v897_v30 = vld [vmem:[%s992_s8 + $0x50] ss:$8 sps:$4 sm:$0x1f]  }
  0x17   : > { %748 = vmatpush3.bf16.msra.mxu0 %v868_v9  ;;  %776 = vmatpush3.bf16.msra.mxu1 %v868_v9  ;;  %v895_v29 = vld [vmem:[%s992_s8 + $0x74] ss:$8 sps:$4 sm:$0x1f]   ;;  %v898_v31 = vld [vmem:[%s992_s8 + $0x70] ss:$8 sps:$4 sm:$0x1f]  }
  0x18   : > { %749 = vmatprep.subr.bf16.mxu0 %v869_v10  ;;  %777 = vmatprep.subr.bf16.mxu1 %v869_v10 }
  0x1b   : > { %750 = vmatpush3.bf16.msra.mxu0 %v870_v13  ;;  %778 = vmatpush3.bf16.msra.mxu1 %v870_v13 }
  0x1c   : > { %751 = vmatprep.subr.bf16.mxu0 %v871_v14  ;;  %779 = vmatprep.subr.bf16.mxu1 %v871_v14 }
  0x1f   : > { %752 = vmatpush3.bf16.msra.mxu0 %v872_v15  ;;  %780 = vmatpush3.bf16.msra.mxu1 %v872_v15 }
  0x20   : > { %753 = vmatprep.subr.bf16.mxu0 %v873_v16  ;;  %781 = vmatprep.subr.bf16.mxu1 %v873_v16 }
  0x23   : > { %754 = vmatpush3.bf16.msra.mxu0 %v874_v17  ;;  %782 = vmatpush3.bf16.msra.mxu1 %v874_v17 }
  0x24   : > { %795 = vmatprep.subr.bf16.mxu0 %v859_v0  ;;  %823 = vmatprep.subr.bf16.mxu1 %v859_v0 }
  0x26   : > { %357 = vmatmul.mubr.bf16.vlgmr.msra.gmra.mrb[0].mxu0 %v875_v18  ;;  %431 = vmatmul.mubr.bf16.vlgmr.msra.gmra.mrb[0].mxu1 %v878_v19 }
  0x27   : > { %796 = vmatpush3.bf16.msra.mxu0 %v941_v1  ;;  %824 = vmatpush3.bf16.msra.mxu1 %v941_v1 }
  0x28   : > { %797 = vmatprep.subr.bf16.mxu0 %v861_v2  ;;  %825 = vmatprep.subr.bf16.mxu1 %v861_v2 }
  0x29   : > { %364 = vmatprep.mubr.bf16.mxu0 %v881_v20  ;;  %438 = vmatprep.mubr.bf16.mxu1 %v883_v21 }
  0x2b   : > { %798 = vmatpush3.bf16.msra.mxu0 %v951_v3  ;;  %826 = vmatpush3.bf16.msra.mxu1 %v951_v3 }
  0x2c   : > { %799 = vmatprep.subr.bf16.mxu0 %v956_v4  ;;  %827 = vmatprep.subr.bf16.mxu1 %v956_v4 }
  0x2e   : > { %365 = vmatmul.mubr.bf16.gmra.mrb[4].mxu0 %v885_v22  ;;  %439 = vmatmul.mubr.bf16.gmra.mrb[4].mxu1 %v886_v23 }
  0x2f   : > { %800 = vmatpush3.bf16.msra.mxu0 %v963_v5  ;;  %828 = vmatpush3.bf16.msra.mxu1 %v963_v5 }
  0x30   : > { %801 = vmatprep.subr.bf16.mxu0 %v972_v6  ;;  %829 = vmatprep.subr.bf16.mxu1 %v972_v6 }
  0x31   : > { %508 = vmatprep.mubr.bf16.mxu0 %v889_v24  ;;  %586 = vmatprep.mubr.bf16.mxu1 %v892_v25 }
  0x33   : > { %802 = vmatpush3.bf16.msra.mxu0 %v979_v7  ;;  %830 = vmatpush3.bf16.msra.mxu1 %v979_v7 }
  0x34   : > { %803 = vmatprep.subr.bf16.mxu0 %v987_v8  ;;  %831 = vmatprep.subr.bf16.mxu1 %v987_v8 }
  0x37   : > { %804 = vmatpush3.bf16.msra.mxu0 %v868_v9  ;;  %832 = vmatpush3.bf16.msra.mxu1 %v868_v9  ;;  %v734_v9 = vld [vmem:[%s1061_s2] ss:$0 sm:$0xff] }
  0x38   : > { %805 = vmatprep.subr.bf16.mxu0 %v869_v10  ;;  %833 = vmatprep.subr.bf16.mxu1 %v869_v10 }
  0x3b   : > { %806 = vmatpush3.bf16.msra.mxu0 %v870_v13  ;;  %834 = vmatpush3.bf16.msra.mxu1 %v870_v13 }
  0x3c   : > { %807 = vmatprep.subr.bf16.mxu0 %v871_v14  ;;  %835 = vmatprep.subr.bf16.mxu1 %v871_v14 }
  0x3f   : > { %808 = vmatpush3.bf16.msra.mxu0 %v872_v15  ;;  %836 = vmatpush3.bf16.msra.mxu1 %v872_v15 }
  0x40   : > { %809 = vmatprep.subr.bf16.mxu0 %v873_v16  ;;  %837 = vmatprep.subr.bf16.mxu1 %v873_v16 }
  0x43   : > { %810 = vmatpush3.bf16.msra.mxu0 %v874_v17  ;;  %838 = vmatpush3.bf16.msra.mxu1 %v874_v17 }
  0x46   : > { %509 = vmatmul.mubr.bf16.vlgmr.msra.gmra.mrb[8].mxu0 %v887_v26  ;;  %587 = vmatmul.mubr.bf16.vlgmr.msra.gmra.mrb[8].mxu1 %v890_v27 }
  0x47   : > { %516 = vmatprep.mubr.bf16.mxu0 %v893_v28  ;;  %594 = vmatprep.mubr.bf16.mxu1 %v895_v29 }
  0x4e   : > { %517 = vmatmul.mubr.bf16.gmra.mrb[12].mxu0 %v897_v30  ;;  %595 = vmatmul.mubr.bf16.gmra.mrb[12].mxu1 %v898_v31 }
  0xf9   : > { %v755_v32 = vpop.f32.mrb[0].mxu0  ;;  %v783_v33 = vpop.f32.mrb[0].mxu1 }
  0xfa   : > { %v756_v34 = vpop.f32.mrb[1].mxu0  ;;  %v784_v35 = vpop.f32.mrb[1].mxu1 }
  0xfb   : > { %v757_v36 = vadd.f32 %v756_v34, %v755_v32  ;;  %v785_v37 = vadd.f32 %v784_v35, %v783_v33  ;;  %v758_v38 = vpop.f32.mrb[2].mxu0  ;;  %v786_v39 = vpop.f32.mrb[2].mxu1 }
  0xfc   : > { %v759_v40 = vpop.f32.mrb[3].mxu0  ;;  %v787_v41 = vpop.f32.mrb[3].mxu1 }
  0xfd   : > { %v447_v42 = vmax.f32 %v757_v36, %v785_v37  ;;  %v760_v43 = vadd.f32 %v759_v40, %v758_v38  ;;  %v788_v44 = vadd.f32 %v787_v41, %v786_v39 }
  0xff   : > { %v448_v45 = vmax.f32 %v760_v43, %v788_v44 }
 0x101   : > { %v761_v46 = vpop.f32.mrb[4].mxu0  ;;  %v789_v47 = vpop.f32.mrb[4].mxu1 }
 0x102   : > { %v762_v48 = vpop.f32.mrb[5].mxu0  ;;  %v790_v49 = vpop.f32.mrb[5].mxu1 }
 0x103   : > { %v763_v50 = vadd.f32 %v762_v48, %v761_v46  ;;  %v791_v51 = vadd.f32 %v790_v49, %v789_v47  ;;  %v764_v52 = vpop.f32.mrb[6].mxu0  ;;  %v792_v53 = vpop.f32.mrb[6].mxu1 }
 0x104   : > { %v765_v54 = vpop.f32.mrb[7].mxu0  ;;  %v793_v55 = vpop.f32.mrb[7].mxu1 }
 0x105   : > { %v449_v56 = vmax.f32 %v763_v50, %v791_v51  ;;  %v766_v57 = vadd.f32 %v765_v54, %v764_v52  ;;  %v794_v58 = vadd.f32 %v793_v55, %v792_v53 }
 0x107   : > { %v450_v59 = vmax.f32 %v766_v57, %v794_v58 }
 0x119   : > { %v811_v60 = vpop.f32.mrb[8].mxu0  ;;  %v839_v61 = vpop.f32.mrb[8].mxu1 }
 0x11a   : > { %v812_v62 = vpop.f32.mrb[9].mxu0  ;;  %v840_v63 = vpop.f32.mrb[9].mxu1 }
 0x11b   : > { %v813_v0 = vadd.f32 %v812_v62, %v811_v60  ;;  %v841_v1 = vadd.f32 %v840_v63, %v839_v61  ;;  %v814_v2 = vpop.f32.mrb[10].mxu0  ;;  %v842_v3 = vpop.f32.mrb[10].mxu1 }
 0x11c   : > { %v815_v4 = vpop.f32.mrb[11].mxu0  ;;  %v843_v5 = vpop.f32.mrb[11].mxu1 }
 0x11d   : > { %v525_v6 = vmax.f32 %v447_v42, %v813_v0  ;;  %v816_v7 = vadd.f32 %v815_v4, %v814_v2  ;;  %v844_v8 = vadd.f32 %v843_v5, %v842_v3 }
 0x11f   : > { %v603_v10 = vmax.f32 %v525_v6, %v841_v1  ;;  %v526_v11 = vmax.f32 %v448_v45, %v816_v7 }
 0x121   : > { %v614_v12 = vadd.f32 %v734_v9, %v603_v10  ;;  %v604_v13 = vmax.f32 %v526_v11, %v844_v8  ;;  %v817_v14 = vpop.f32.mrb[12].mxu0  ;;  %v845_v15 = vpop.f32.mrb[12].mxu1 }
 0x122   : > { %v818_v16 = vpop.f32.mrb[13].mxu0  ;;  %v846_v17 = vpop.f32.mrb[13].mxu1 }
 0x123   : > { %v618_v18 = vmax.f32 %v614_v12, 0.0  ;;  %v615_v19 = vadd.f32 %v734_v9, %v604_v13  ;;  %v819_v20 = vadd.f32 %v818_v16, %v817_v14  ;;  %v847_v21 = vadd.f32 %v846_v17, %v845_v15  ;;  %v820_v22 = vpop.f32.mrb[14].mxu0  ;;  %v848_v23 = vpop.f32.mrb[14].mxu1 }
 0x124   : > { %v821_v24 = vpop.f32.mrb[15].mxu0  ;;  %v849_v25 = vpop.f32.mrb[15].mxu1 }
 0x125   : > { %622 = vst [vmem:[%s170_s30] sm:$0xff] %v618_v18  ;;  %v619_v26 = vmax.f32 %v615_v19, 0.0  ;;  %v527_v27 = vmax.f32 %v449_v56, %v819_v20  ;;  %v822_v28 = vadd.f32 %v821_v24, %v820_v22  ;;  %v850_v29 = vadd.f32 %v849_v25, %v848_v23 }
 0x127   : > { %623 = vst [vmem:[%s170_s30 + $0x8] sm:$0xff] %v619_v26  ;;  %v605_v30 = vmax.f32 %v527_v27, %v847_v21  ;;  %v528_v31 = vmax.f32 %v450_v59, %v822_v28 }
 0x129   : > { %v616_v32 = vadd.f32 %v734_v9, %v605_v30  ;;  %v606_v33 = vmax.f32 %v528_v31, %v850_v29 }
 0x12b   : > { %v620_v34 = vmax.f32 %v616_v32, 0.0  ;;  %v617_v35 = vadd.f32 %v734_v9, %v606_v33 }
 0x12d   : > { %624 = vst [vmem:[%s170_s30 + $0x10] sm:$0xff] %v620_v34  ;;  %v621_v36 = vmax.f32 %v617_v35, 0.0 }
 0x12f   : > { %625 = vst [vmem:[%s170_s30 + $0x18] sm:$0x1] %v621_v36 }
 0x130 PF: > { %s13_s12 = sadd.s32 1, %s905_s12  }
 0x131   : > { %p10_p4 = scmp.ge.s32.totalorder %s13_s12, 4  }
 0x133   :  { %12 = sbr.rel (!%p10_p4) target bundleno = 1 (0x1), region = 65 }

// kernel: net_forward.5
= control target key start
LH: loop header
LB: loop body
LE: loop exit
PB: predicated region body
PF: predicated region fallthrough
CT: control target
= control target key end

     0   :  { %v828_v39 = vmov 0.0   ;;  %vm829_vm0 = vmmov 0   ;;  %s1050_s1 = inlined_call_operand.vmem [shape: bf16[512,128], index: 1, kind: input, shape index: {}]   ;;  %s1051_s0 = inlined_call_operand.vmem [shape: bf16[8,512], index: 0, kind: input, shape index: {}]   ;;  %s1052_s3 = inlined_call_operand.vmem [shape: bf16[128,128], index: 3, kind: input, shape index: {}]   ;;  %s1053_s5 = inlined_call_operand.vmem [shape: bf16[128,128], index: 5, kind: input, shape index: {}]   ;;  %s1054_s2 = inlined_call_operand.vmem [shape: f32[1,128], index: 2, kind: input, shape index: {}]   ;;  %s1055_s4 = inlined_call_operand.vmem [shape: f32[1,128], index: 4, kind: input, shape index: {}]   ;;  %s1056_s6 = inlined_call_operand.vmem [shape: f32[1,128], index: 6, kind: input, shape index: {}]   ;;  %s1057_s7 = inlined_call_operand.vmem [shape: f32[8,128], index: 7, kind: output, shape index: {}]  }
   0x1   :  { %v776_v0 = vld [vmem:[%s1050_s1 + $0x40] sm:$0xff]   ;;  %v780_v4 = vld [vmem:[%s1050_s1 + $0x48] sm:$0xff]   ;;  %v784_v8 = vld [vmem:[%s1050_s1 + $0x50] sm:$0xff]  }
   0x2   :  { %v777_v1 = vld [vmem:[%s1050_s1 + $0xc0] sm:$0xff]   ;;  %672 = vmatprep.subr.bf16.mxu0 %v776_v0  ;;  %v781_v5 = vld [vmem:[%s1050_s1 + $0xc8] sm:$0xff]   ;;  %v785_v9 = vld [vmem:[%s1050_s1 + $0xd0] sm:$0xff]  }
   0x3   :  { %v778_v2 = vld [vmem:[%s1050_s1] sm:$0xff]   ;;  %694 = vmatprep.subr.bf16.mxu1 %v777_v1  ;;  %v782_v6 = vld [vmem:[%s1050_s1 + $0x8] sm:$0xff]   ;;  %v786_v10 = vld [vmem:[%s1050_s1 + $0x10] sm:$0xff]  }
   0x4   :  { %v779_v3 = vld [vmem:[%s1050_s1 + $0x80] sm:$0xff]   ;;  %673 = vmatpush3.bf16.msra.mxu0 %v778_v2  ;;  %v783_v7 = vld [vmem:[%s1050_s1 + $0x88] sm:$0xff]   ;;  %v787_v11 = vld [vmem:[%s1050_s1 + $0x90] sm:$0xff]  }
   0x5   :  { %695 = vmatpush3.bf16.msra.mxu1 %v779_v3  ;;  %674 = vmatprep.subr.bf16.mxu0 %v780_v4  ;;  %v788_v12 = vld [vmem:[%s1050_s1 + $0x58] sm:$0xff]   ;;  %v792_v16 = vld [vmem:[%s1050_s1 + $0x60] sm:$0xff]   ;;  %v796_v20 = vld [vmem:[%s1050_s1 + $0x68] sm:$0xff]  }
   0x6   :  { %696 = vmatprep.subr.bf16.mxu1 %v781_v5  ;;  %v789_v13 = vld [vmem:[%s1050_s1 + $0xd8] sm:$0xff]   ;;  %v793_v17 = vld [vmem:[%s1050_s1 + $0xe0] sm:$0xff]   ;;  %v797_v21 = vld [vmem:[%s1050_s1 + $0xe8] sm:$0xff]  }
   0x7   :  { %v790_v14 = vld [vmem:[%s1050_s1 + $0x18] sm:$0xff]   ;;  %v794_v18 = vld [vmem:[%s1050_s1 + $0x20] sm:$0xff]   ;;  %v798_v22 = vld [vmem:[%s1050_s1 + $0x28] sm:$0xff]  }
   0x8   :  { %675 = vmatpush3.bf16.msra.mxu0 %v782_v6  ;;  %v791_v15 = vld [vmem:[%s1050_s1 + $0x98] sm:$0xff]   ;;  %v795_v19 = vld [vmem:[%s1050_s1 + $0xa0] sm:$0xff]   ;;  %v799_v23 = vld [vmem:[%s1050_s1 + $0xa8] sm:$0xff]  }
   0x9   :  { %697 = vmatpush3.bf16.msra.mxu1 %v783_v7  ;;  %676 = vmatprep.subr.bf16.mxu0 %v784_v8  ;;  %v800_v24 = vld [vmem:[%s1050_s1 + $0x70] sm:$0xff]   ;;  %v804_v28 = vld [vmem:[%s1050_s1 + $0x78] sm:$0xff]   ;;  %v27_v32 = vld [vmem:[%s1051_s0] sm:$0xff] }
   0xa   :  { %698 = vmatprep.subr.bf16.mxu1 %v785_v9  ;;  %v801_v25 = vld [vmem:[%s1050_s1 + $0xf0] sm:$0xff]   ;;  %v805_v29 = vld [vmem:[%s1050_s1 + $0xf8] sm:$0xff]   ;;  %v28_v33 = vld [vmem:[%s1051_s0 + $0x8] sm:$0xff]  ;;  %v618_v34 = vcombine.low %v27_v32, %v27_v32  ;;  %v619_v35 = vcombine.high %v27_v32, %v27_v32 }
   0xb   :  { %v802_v26 = vld [vmem:[%s1050_s1 + $0x30] sm:$0xff]   ;;  %v806_v30 = vld [vmem:[%s1050_s1 + $0x38] sm:$0xff]   ;;  %v620_v36 = vcombine.low %v28_v33, %v28_v33  ;;  %v621_v37 = vcombine.high %v28_v33, %v28_v33  ;;  %v812_v38 = vld [vmem:[%s1052_s3] sm:$0xff]  }
   0xc   :  { %677 = vmatpush3.bf16.msra.mxu0 %v786_v10  ;;  %v803_v27 = vld [vmem:[%s1050_s1 + $0xb0] sm:$0xff]   ;;  %v807_v31 = vld [vmem:[%s1050_s1 + $0xb8] sm:$0xff]   ;;  %338 = vmatprep.mubr.bf16.mxu0 %v619_v35  ;;  %v813_v40 = vld [vmem:[%s1052_s3 + $0x8] sm:$0xff]  }
   0xd   :  { %699 = vmatpush3.bf16.msra.mxu1 %v787_v11  ;;  %678 = vmatprep.subr.bf16.mxu0 %v788_v12  ;;  %v814_v41 = vld [vmem:[%s1052_s3 + $0x10] sm:$0xff]   ;;  %v815_v42 = vld [vmem:[%s1052_s3 + $0x18] sm:$0xff]   ;;  %v816_v43 = vld [vmem:[%s1052_s3 + $0x20] sm:$0xff]  }
   0xe   :  { %700 = vmatprep.subr.bf16.mxu1 %v789_v13  ;;  %378 = vmatprep.mubr.bf16.mxu1 %v621_v37  ;;  %v817_v44 = vld [vmem:[%s1052_s3 + $0x28] sm:$0xff]   ;;  %v818_v45 = vld [vmem:[%s1052_s3 + $0x30] sm:$0xff]   ;;  %v819_v46 = vld [vmem:[%s1052_s3 + $0x38] sm:$0xff]  }
   0xf   :  { %v820_v47 = vld [vmem:[%s1053_s5] sm:$0xff]   ;;  %v821_v48 = vld [vmem:[%s1053_s5 + $0x8] sm:$0xff]   ;;  %v822_v49 = vld [vmem:[%s1053_s5 + $0x10] sm:$0xff]  }
  0x10   :  { %679 = vmatpush3.bf16.msra.mxu0 %v790_v14  ;;  %v823_v50 = vld [vmem:[%s1053_s5 + $0x18] sm:$0xff]   ;;  %v824_v51 = vld [vmem:[%s1053_s5 + $0x20] sm:$0xff]   ;;  %v825_v52 = vld [vmem:[%s1053_s5 + $0x28] sm:$0xff]  }
  0x11   :  { %701 = vmatpush3.bf16.msra.mxu1 %v791_v15  ;;  %680 = vmatprep.subr.bf16.mxu0 %v792_v16  ;;  %v617_v55 = vld [vmem:[%s1054_s2] ss:$0 sm:$0xff]  ;;  %v826_v4 = vld [vmem:[%s1053_s5 + $0x30] sm:$0xff]   ;;  %v827_v5 = vld [vmem:[%s1053_s5 + $0x38] sm:$0xff]  }
  0x12   :  { %702 = vmatprep.subr.bf16.mxu1 %v793_v17  ;;  %v654_v6 = vld [vmem:[%s1055_s4] ss:$0 sm:$0xff] }
  0x13   :  { %v663_v14 = vld [vmem:[%s1056_s6] ss:$0 sm:$0xff] }
  0x14   :  { %681 = vmatpush3.bf16.msra.mxu0 %v794_v18 }
  0x15   :  { %703 = vmatpush3.bf16.msra.mxu1 %v795_v19  ;;  %682 = vmatprep.subr.bf16.mxu0 %v796_v20 }
  0x16   :  { %704 = vmatprep.subr.bf16.mxu1 %v797_v21 }
  0x18   :  { %683 = vmatpush3.bf16.msra.mxu0 %v798_v22 }
  0x19   :  { %705 = vmatpush3.bf16.msra.mxu1 %v799_v23  ;;  %684 = vmatprep.subr.bf16.mxu0 %v800_v24 }
  0x1a   :  { %706 = vmatprep.subr.bf16.mxu1 %v801_v25 }
  0x1c   :  { %685 = vmatpush3.bf16.msra.mxu0 %v802_v26 }
  0x1d   :  { %707 = vmatpush3.bf16.msra.mxu1 %v803_v27  ;;  %686 = vmatprep.subr.bf16.mxu0 %v804_v28 }
  0x1e   :  { %708 = vmatprep.subr.bf16.mxu1 %v805_v29 }
  0x20   :  { %687 = vmatpush3.bf16.msra.mxu0 %v806_v30 }
  0x21   :  { %709 = vmatpush3.bf16.msra.mxu1 %v807_v31  ;;  %734 = vmatprep.subr.bf16.mxu0 %v828_v39 }
  0x22   :  { %754 = vmatprep.subr.bf16.mxu1 %v828_v39 }
  0x23   :  { %339 = vmatmul.mubr.bf16.vlgmr.msra.gmra.mrb[0].mxu0 %v618_v34 }
  0x24   :  { %379 = vmatmul.mubr.bf16.vlgmr.msra.gmra.mrb[0].mxu1 %v620_v36  ;;  %735 = vmatpush3.bf16.msra.mxu0 %v812_v38 }
  0x25   :  { %736 = vmatprep.subr.bf16.mxu0 %v828_v39  ;;  %750 = vmatprep.mubr.msk.bf16.mxu0 %vm829_vm0, %v828_v39 }
  0x26   :  { %770 = vmatprep.mubr.msk.bf16.mxu1 %vm829_vm0, %v828_v39  ;;  %755 = vmatpush3.bf16.msra.mxu1 %v820_v47 }
  0x27   :  { %756 = vmatprep.subr.bf16.mxu1 %v828_v39 }
  0x28   :  { %737 = vmatpush3.bf16.msra.mxu0 %v813_v40 }
  0x29   :  { %738 = vmatprep.subr.bf16.mxu0 %v828_v39 }
  0x2a   :  { %757 = vmatpush3.bf16.msra.mxu1 %v821_v48 }
  0x2b   :  { %758 = vmatprep.subr.bf16.mxu1 %v828_v39 }
  0x2c   :  { %739 = vmatpush3.bf16.msra.mxu0 %v814_v41 }
  0x2d   :  { %740 = vmatprep.subr.bf16.mxu0 %v828_v39 }
  0x2e   :  { %759 = vmatpush3.bf16.msra.mxu1 %v822_v49 }
  0x2f   :  { %760 = vmatprep.subr.bf16.mxu1 %v828_v39 }
  0x30   :  { %741 = vmatpush3.bf16.msra.mxu0 %v815_v42 }
  0x31   :  { %742 = vmatprep.subr.bf16.mxu0 %v828_v39 }
  0x32   :  { %761 = vmatpush3.bf16.msra.mxu1 %v823_v50 }
  0x33   :  { %762 = vmatprep.subr.bf16.mxu1 %v828_v39 }
  0x34   :  { %743 = vmatpush3.bf16.msra.mxu0 %v816_v43 }
  0x35   :  { %744 = vmatprep.subr.bf16.mxu0 %v828_v39 }
  0x36   :  { %763 = vmatpush3.bf16.msra.mxu1 %v824_v51 }
  0x37   :  { %764 = vmatprep.subr.bf16.mxu1 %v828_v39 }
  0x38   :  { %745 = vmatpush3.bf16.msra.mxu0 %v817_v44 }
  0x39   :  { %746 = vmatprep.subr.bf16.mxu0 %v828_v39 }
  0x3a   :  { %765 = vmatpush3.bf16.msra.mxu1 %v825_v52 }
  0x3b   :  { %766 = vmatprep.subr.bf16.mxu1 %v828_v39 }
  0x3c   :  { %747 = vmatpush3.bf16.msra.mxu0 %v818_v45 }
  0x3d   :  { %748 = vmatprep.subr.bf16.mxu0 %v828_v39 }
  0x3e   :  { %767 = vmatpush3.bf16.msra.mxu1 %v826_v4 }
  0x3f   :  { %768 = vmatprep.subr.bf16.mxu1 %v828_v39 }
  0x40   :  { %749 = vmatpush3.bf16.msra.mxu0 %v819_v46 }
  0x42   :  { %769 = vmatpush3.bf16.msra.mxu1 %v827_v5 }
  0xf6   :  { %v688_v53 = vpop.f32.mrb[0].mxu0 }
  0xf7   :  { %v710_v54 = vpop.f32.mrb[0].mxu1  ;;  %v689_v56 = vpop.f32.mrb[1].mxu0 }
  0xf8   :  { %v711_v57 = vpop.f32.mrb[1].mxu1  ;;  %v690_v58 = vadd.f32 %v689_v56, %v688_v53  ;;  %v691_v60 = vpop.f32.mrb[2].mxu0 }
  0xf9   :  { %v712_v59 = vadd.f32 %v711_v57, %v710_v54  ;;  %v713_v61 = vpop.f32.mrb[2].mxu1  ;;  %v692_v62 = vpop.f32.mrb[3].mxu0 }
  0xfa   :  { %v714_v63 = vpop.f32.mrb[3].mxu1  ;;  %v341_v0 = vadd.f32 %v690_v58, %v617_v55 }
  0xfc   :  { %v381_v1 = vadd.f32 %v712_v59, %v341_v0 }
  0xfe   :  { %v386_v2 = vmax.f32 %v381_v1, 0.0 }
 0x100   :  { %v387_v3 = vpack.c.bf16 %v386_v2, %v386_v2 }
 0x102   :  { %751 = vmatmul.mubr.bf16.vlgmr.msra.gmra.mrb[4].mxu0 %v387_v3 }
 0x1d5   :  { %v493_v7 = vpop.f32.mrb[4].mxu0 }
 0x1d6   :  { %v494_v8 = vadd.f32 %v654_v6, %v493_v7  ;;  %v752_v9 = vpop.f32.mrb[5].mxu0 }
 0x1d7   :  { %v496_v10 = vpop.f32.mrb[6].mxu0 }
 0x1d8   :  { %v499_v11 = vmax.f32 %v494_v8, 0.0  ;;  %v753_v12 = vpop.f32.mrb[7].mxu0 }
 0x1da   :  { %v500_v13 = vpack.c.bf16 %v499_v11, %v499_v11 }
 0x1dc   :  { %771 = vmatmul.mubr.bf16.vlgmr.msra.gmra.mrb[4].mxu1 %v500_v13 }
 0x2af   :  { %v606_v15 = vpop.f32.mrb[4].mxu1 }
 0x2b0   :  { %v607_v16 = vadd.f32 %v663_v14, %v606_v15  ;;  %v772_v17 = vpop.f32.mrb[5].mxu1 }
 0x2b1   :  { %v609_v18 = vpop.f32.mrb[6].mxu1 }
 0x2b2   :  { %612 = vst [vmem:[%s1057_s7] sm:$0xff] %v607_v16  ;;  %v773_v19 = vpop.f32.mrb[7].mxu1 }

</bundles_post_ra>
